<compile_context>
chip_gen: v6e
topology: v6e:2x2x1
jax: 0.10.0
libtpu: 0.0.40
codegen_flags: <defaults>
</compile_context>

<pallas_src>
import functools

import jax
import jax.numpy as jnp
from jax.experimental import pallas as pl
from jax.experimental.pallas import tpu as pltpu

BN_EPS = 1e-5          # nn.BatchNorm2d default
LANE = 128
SUBLANE = 8
MAX_TM = 1024          # row-tile cap; ~31 MiB worst-case VMEM at 512 channels


# ---------------------------------------------------------------------------
# small helpers
# ---------------------------------------------------------------------------
def _round_up(x, m):
    return (x + m - 1) // m * m


@functools.lru_cache(maxsize=None)
def _vmem_limit():
    """Per-generation VMEM budget: ~3/4 of physical, capped at 100 MiB.
    v5e/v6e (128 MiB) -> 96 MiB; v7x (64 MiB) -> 48 MiB; 48 MiB fallback."""
    cap = 64 * 1024 * 1024
    try:
        cap = int(pltpu.get_tpu_info().vmem_capacity_bytes)
    except Exception:
        pass
    return int(min(cap * 3 // 4, 100 * 1024 * 1024))


def _choose_row_tiling(m):
    """Return (tm, m_pad) with tm % 8 == 0 and tm | m_pad.

    When the whole problem fits one tile we still split it in two (when it
    splits into 16-row multiples) so the 'parallel' M axis can span both
    TensorCores on v7x; the extra grid step is ~0.35us noise on v5e/v6e."""
    m8 = _round_up(m, SUBLANE)
    if m8 <= MAX_TM:
        if m8 % 32 == 0:
            return m8 // 2, m8           # two tiles, each a multiple of 16
        return m8, m8                     # tiny problem: single full-dim tile
    return MAX_TM, _round_up(m, MAX_TM)


def _pad2d(x, rows, cols):
    r, c = x.shape
    if r == rows and c == cols:
        return x
    return jnp.pad(x, ((0, rows - r), (0, cols - c)))


# ---------------------------------------------------------------------------
# Kernel A: per-M-tile matmul (bf16 in, f32 acc) + per-channel BN partial sums
#   grid = (M tiles,); A block = full K band, W block = whole (resident) matrix
# ---------------------------------------------------------------------------
def _matmul_stats_kernel(a_ref, w_ref, t_ref, stats_ref):
    acc = jnp.dot(a_ref[...], w_ref[...], preferred_element_type=jnp.float32)
    t_ref[...] = acc.astype(t_ref.dtype)               # bf16 store (half traffic)
    # BN partials from the f32 accumulator; two sub-row stores, no iota/where.
    stats_ref[...] = jnp.zeros_like(stats_ref)
    stats_ref[0:1, :] = jnp.sum(acc, axis=0, keepdims=True)
    stats_ref[1:2, :] = jnp.sum(acc * acc, axis=0, keepdims=True)


def matmul_with_stats(a, w):
    """a:(M,K), w:(K,C) -> t:(M_pad,C_pad) bf16, col_sum:(C_pad,), col_ssq:(C_pad,).

    Inputs are fed to the MXU in bf16 with f32 accumulation.  Zero padding of
    rows / K / C is exact: padded rows/columns contribute 0 to the sums.
    The largest BasicBlock weight matrix (K=4608, C=512) is ~4.7 MiB in bf16,
    so it stays resident in VMEM for the whole grid."""
    M, K = a.shape
    K2, C = w.shape
    assert K == K2
    tm, m_pad = _choose_row_tiling(M)
    k_pad = _round_up(K, LANE)
    c_pad = _round_up(C, LANE)

    a_p = _pad2d(a.astype(jnp.bfloat16), m_pad, k_pad)
    w_p = _pad2d(w.astype(jnp.bfloat16), k_pad, c_pad)
    m_tiles = m_pad // tm

    t, stats = pl.pallas_call(
        _matmul_stats_kernel,
        out_shape=(jax.ShapeDtypeStruct((m_pad, c_pad), jnp.bfloat16),
                   jax.ShapeDtypeStruct((m_tiles * SUBLANE, c_pad), jnp.float32)),
        grid=(m_tiles,),
        in_specs=[
            pl.BlockSpec((tm, k_pad), lambda i: (i, 0)),
            pl.BlockSpec((k_pad, c_pad), lambda i: (0, 0)),   # resident weights
        ],
        out_specs=(
            pl.BlockSpec((tm, c_pad), lambda i: (i, 0)),
            pl.BlockSpec((SUBLANE, c_pad), lambda i: (i, 0)),
        ),
        compiler_params=pltpu.CompilerParams(
            dimension_semantics=("parallel",),
            vmem_limit_bytes=_vmem_limit()),
    )(a_p, w_p)

    col_sum = jnp.sum(stats[0::SUBLANE, :], axis=0)
    col_ssq = jnp.sum(stats[1::SUBLANE, :], axis=0)
    return t, col_sum, col_ssq


def _bn_scale_bias(col_sum, col_ssq, m_true, gamma_pad, beta_pad, eps=BN_EPS):
    """Fold batch-stats BN into per-channel scale/bias (f32, tiny plain-JAX)."""
    inv_m = 1.0 / float(m_true)
    mu = col_sum * inv_m
    var = jnp.maximum(col_ssq * inv_m - mu * mu, 0.0)   # guard cancellation
    inv = jax.lax.rsqrt(var + eps)
    scale = gamma_pad * inv                              # padded gamma==0 -> 0
    bias = beta_pad - mu * scale
    c = scale.shape[0]
    return scale.reshape(1, c), bias.reshape(1, c)


# ---------------------------------------------------------------------------
# Kernel B: tiled elementwise epilogue
#   out = [relu]( t*scale + bias  [+ shortcut            (identity)
#                                  | + shortcut*s_scale+s_bias  (projection)] )
# ---------------------------------------------------------------------------
def _make_affine_kernel(residual, residual_affine, apply_relu):
    def kernel(*refs):
        if residual and residual_affine:
            t_ref, sc_ref, sb_ref, s_ref, ssc_ref, ssb_ref, o_ref = refs
        elif residual:
            t_ref, sc_ref, sb_ref, s_ref, o_ref = refs
        else:
            t_ref, sc_ref, sb_ref, o_ref = refs
        out = t_ref[...].astype(jnp.float32) * sc_ref[...] + sb_ref[...]
        if residual:
            s = s_ref[...].astype(jnp.float32)
            if residual_affine:
                s = s * ssc_ref[...] + ssb_ref[...]
            out = out + s
        if apply_relu:
            out = jnp.maximum(out, 0.0)
        o_ref[...] = out.astype(o_ref.dtype)             # single lane-dense store
    return kernel


def affine_act(t, scale, bias, shortcut=None, s_scale=None, s_bias=None,
               relu=True, out_dtype=jnp.float32):
    m_pad, c_pad = t.shape
    tm, _ = _choose_row_tiling(m_pad)
    m_tiles = m_pad // tm
    residual = shortcut is not None
    residual_affine = s_scale is not None

    row_spec = pl.BlockSpec((tm, c_pad), lambda i: (i, 0))
    vec_spec = pl.BlockSpec((1, c_pad), lambda i: (0, 0))

    inputs = [t, scale, bias]
    in_specs = [row_spec, vec_spec, vec_spec]
    if residual:
        inputs.append(shortcut)
        in_specs.append(row_spec)
        if residual_affine:
            inputs += [s_scale, s_bias]
            in_specs += [vec_spec, vec_spec]

    return pl.pallas_call(
        _make_affine_kernel(residual, residual_affine, relu),
        out_shape=jax.ShapeDtypeStruct((m_pad, c_pad), out_dtype),
        grid=(m_tiles,),
        in_specs=in_specs,
        out_specs=row_spec,
        compiler_params=pltpu.CompilerParams(
            dimension_semantics=("parallel",),
            vmem_limit_bytes=_vmem_limit()),
    )(*inputs)


# ---------------------------------------------------------------------------
# Plain-JAX glue: im2col (bf16) and torch-weight reshaping
# ---------------------------------------------------------------------------
def im2col(x_nhwc, ksize, stride, padding):
    N, H, W, C = x_nhwc.shape
    Ho = (H + 2 * padding - ksize) // stride + 1
    Wo = (W + 2 * padding - ksize) // stride + 1
    xp = jnp.pad(x_nhwc, ((0, 0), (padding, padding), (padding, padding), (0, 0)))
    cols = []
    for kh in range(ksize):
        for kw in range(ksize):
            cols.append(xp[:,
                           kh:kh + (Ho - 1) * stride + 1:stride,
                           kw:kw + (Wo - 1) * stride + 1:stride,
                           :])
    patches = jnp.concatenate(cols, axis=-1)               # (N,Ho,Wo,k*k*C)
    return patches.reshape(N * Ho * Wo, ksize * ksize * C), (N, Ho, Wo)


def torch_conv_weight_to_matmul(w):
    """(Cout,Cin,KH,KW) -> (KH*KW*Cin, Cout), matching im2col (kh,kw,cin) order."""
    cout = w.shape[0]
    return jnp.transpose(w, (2, 3, 1, 0)).reshape(-1, cout)


# ---------------------------------------------------------------------------
# BasicBlock forward
# ---------------------------------------------------------------------------
@functools.partial(jax.jit, static_argnames=("stride",))
def basic_block_forward(x_nchw, params, stride):
    x = jnp.transpose(x_nchw, (0, 2, 3, 1)).astype(jnp.float32)   # NCHW->NHWC
    N, H, W, cin = x.shape
    planes = params["conv1_w"].shape[0]
    c_pad = _round_up(planes, LANE)
    x_bf = x.astype(jnp.bfloat16)

    def pad_c(v):
        return jnp.pad(v.astype(jnp.float32), (0, c_pad - planes))

    # conv1 (3x3, stride) -> bn1 -> relu  (out kept channel-padded, bf16)
    a1, (N, Ho, Wo) = im2col(x_bf, 3, stride, 1)
    M = N * Ho * Wo
    t1, s1, q1 = matmul_with_stats(a1, torch_conv_weight_to_matmul(params["conv1_w"]))
    sc1, bi1 = _bn_scale_bias(s1, q1, M, pad_c(params["bn1_g"]), pad_c(params["bn1_b"]))
    out1_p = affine_act(t1, sc1, bi1, relu=True, out_dtype=jnp.bfloat16)
    m_pad = out1_p.shape[0]
    # Padded channels of out1 are exactly 0 (gamma/beta padded with 0, relu(0)=0),
    # so conv2 consumes the padded activation directly with zero-padded weight rows.
    out1 = out1_p[:M].reshape(N, Ho, Wo, c_pad)                    # bf16

    # conv2 (3x3, stride 1): weight Cin axis zero-padded to c_pad to match out1.
    a2, _ = im2col(out1, 3, 1, 1)
    w2 = jnp.transpose(params["conv2_w"], (2, 3, 1, 0))            # (3,3,planes,planes)
    w2 = jnp.pad(w2, ((0, 0), (0, 0), (0, c_pad - planes), (0, 0)))
    w2 = w2.reshape(9 * c_pad, planes)
    t2, s2, q2 = matmul_with_stats(a2, w2)
    sc2, bi2 = _bn_scale_bias(s2, q2, M, pad_c(params["bn2_g"]), pad_c(params["bn2_b"]))
    m_pad2 = t2.shape[0]

    # shortcut: projection (1x1 conv + BN, its BN affine fused into the final
    # elementwise kernel) or identity (bf16, no dummy affine FMA).
    if stride != 1 or cin != planes:
        xs = x_bf[:, ::stride, ::stride, :].reshape(M, cin)
        ts, ss, qs = matmul_with_stats(xs, torch_conv_weight_to_matmul(params["sc_w"]))
        scs, bis = _bn_scale_bias(ss, qs, M, pad_c(params["bns_g"]), pad_c(params["bns_b"]))
        out2_p = affine_act(t2, sc2, bi2, shortcut=ts, s_scale=scs, s_bias=bis,
                            relu=True, out_dtype=jnp.float32)
    else:
        sc_t = _pad2d(x_bf.reshape(M, cin), m_pad2, c_pad)         # bf16 identity
        out2_p = affine_act(t2, sc2, bi2, shortcut=sc_t,
                            relu=True, out_dtype=jnp.float32)

    out = out2_p[:M, :planes].reshape(N, Ho, Wo, planes)
    return jnp.transpose(out, (0, 3, 1, 2))                        # NHWC->NCHW


# ---------------------------------------------------------------------------
# Pure-JAX references (correctness checks)
# ---------------------------------------------------------------------------
def _ref_conv(x_nhwc, w_torch, stride, cast_bf16=False):
    w = jnp.transpose(w_torch, (2, 3, 1, 0))                       # HWIO
    xin = x_nhwc
    if cast_bf16:
        xin = xin.astype(jnp.bfloat16)
        w = w.astype(jnp.bfloat16)
    pad = (w_torch.shape[2] - 1) // 2
    return jax.lax.conv_general_dilated(
        xin, w, window_strides=(stride, stride),
        padding=((pad, pad), (pad, pad)),
        dimension_numbers=("NHWC", "HWIO", "NHWC"),
        preferred_element_type=jnp.float32)


def _ref_bn(x_nhwc, g, b, eps=BN_EPS):
    mu = jnp.mean(x_nhwc, axis=(0, 1, 2), keepdims=True)
    var = jnp.mean((x_nhwc - mu) ** 2, axis=(0, 1, 2), keepdims=True)
    return (x_nhwc - mu) * jax.lax.rsqrt(var + eps) * g + b


def basic_block_reference(x_nchw, params, stride, cast_bf16=False):
    x = jnp.transpose(x_nchw, (0, 2, 3, 1)).astype(jnp.float32)
    cin = x.shape[-1]
    planes = params["conv1_w"].shape[0]
    out = jnp.maximum(_ref_bn(_ref_conv(x, params["conv1_w"], stride, cast_bf16),
                              params["bn1_g"], params["bn1_b"]), 0.0)
    out = _ref_bn(_ref_conv(out, params["conv2_w"], 1, cast_bf16),
                  params["bn2_g"], params["bn2_b"])
    if stride != 1 or cin != planes:
        sc = _ref_bn(_ref_conv(x, params["sc_w"], stride, cast_bf16),
                     params["bns_g"], params["bns_b"])
    else:
        sc = x
    out = jnp.maximum(out + sc, 0.0)
    return jnp.transpose(out, (0, 3, 1, 2))


# ---------------------------------------------------------------------------
# Deterministic parameter init + driver
# ---------------------------------------------------------------------------
def init_params(key, in_planes, planes):
    ks = jax.random.split(key, 8)
    return {
        "conv1_w": 0.1 * jax.random.normal(ks[0], (planes, in_planes, 3, 3), jnp.float32),
        "bn1_g": 1.0 + 0.1 * jax.random.normal(ks[1], (planes,), jnp.float32),
        "bn1_b": 0.1 * jax.random.normal(ks[2], (planes,), jnp.float32),
        "conv2_w": 0.1 * jax.random.normal(ks[3], (planes, planes, 3, 3), jnp.float32),
        "bn2_g": 1.0 + 0.1 * jax.random.normal(ks[4], (planes,), jnp.float32),
        "bn2_b": 0.1 * jax.random.normal(ks[5], (planes,), jnp.float32),
        "sc_w": 0.1 * jax.random.normal(ks[6], (planes, in_planes, 1, 1), jnp.float32),
        "bns_g": jnp.ones((planes,), jnp.float32),
        "bns_b": 0.1 * jax.random.normal(ks[7], (planes,), jnp.float32),
    }


if __name__ == "__main__":
    key = jax.random.PRNGKey(0)
    kx, kp = jax.random.split(key)

    # projection-shortcut path: NCHW input, stride 2, channel change
    N, in_planes, H, W = 2, 4, 16, 16
    planes, stride = 8, 2
    x = jax.random.normal(kx, (N, in_planes, H, W), jnp.float32)
    params = init_params(kp, in_planes, planes)

    out = jax.block_until_ready(basic_block_forward(x, params, stride))
    assert out.shape == (N, planes, H // stride, W // stride), out.shape

    # strict-ish check vs a reference using the same bf16-input matmul policy,
    # loose sanity check vs the exact fp32 PyTorch-semantics reference
    # (bf16 input rounding + bf16 pre-BN activation storage account for the gap).
    ref_m = basic_block_reference(x, params, stride, cast_bf16=True)
    ref_f = basic_block_reference(x, params, stride, cast_bf16=False)
    err_m = float(jnp.max(jnp.abs(out - ref_m)))
    err_f = float(jnp.max(jnp.abs(out - ref_f)))
    assert err_m < 6e-2, ("bf16-matched mismatch", err_m)
    assert err_f < 2e-1, ("f32 sanity mismatch", err_f)

    # identity-shortcut path (stride=1, in_planes == planes)
    params_id = init_params(kp, planes, planes)
    x_id = jax.random.normal(kx, (N, planes, H, W), jnp.float32)
    out_id = jax.block_until_ready(basic_block_forward(x_id, params_id, 1))
    ref_id_m = basic_block_reference(x_id, params_id, 1, cast_bf16=True)
    ref_id_f = basic_block_reference(x_id, params_id, 1, cast_bf16=False)
    err_id_m = float(jnp.max(jnp.abs(out_id - ref_id_m)))
    err_id_f = float(jnp.max(jnp.abs(out_id - ref_id_f)))
    assert err_id_m < 6e-2, ("bf16-matched mismatch (identity path)", err_id_m)
    assert err_id_f < 2e-1, ("f32 sanity mismatch (identity path)", err_id_f)

    print("KERNEL_OK")
</pallas_src>

<mosaic_0001>
module attributes {stable_mosaic.version = 11 : i64} {
  func.func @_matmul_stats_kernel(%arg0: i32, %arg1: memref<64x128xbf16, #tpu.memory_space<vmem>>, %arg2: memref<128x128xbf16, #tpu.memory_space<vmem>>, %arg3: memref<64x128xbf16, #tpu.memory_space<vmem>>, %arg4: memref<8x128xf32, #tpu.memory_space<vmem>>) attributes {dimension_semantics = [#tpu.dimension_semantics<parallel>], iteration_bounds = array<i64: 2>, scalar_prefetch = 0 : i64, scratch_operands = 0 : i64, tpu.core_type = #tpu.core_type<tc>, window_params = [{transform_indices = @transform_0, window_bounds = array<i64: 64, 128>}, {pipeline_mode = #tpu.pipeline_mode<synchronous>, transform_indices = @transform_1, window_bounds = array<i64: 128, 128>}, {transform_indices = @transform_2, window_bounds = array<i64: 64, 128>}, {transform_indices = @transform_3, window_bounds = array<i64: 8, 128>}]} {
    %c0 = arith.constant 0 : index
    %c0_0 = arith.constant 0 : index
    %0 = vector.load %arg1[%c0, %c0_0] : memref<64x128xbf16, #tpu.memory_space<vmem>>, vector<64x128xbf16>
    %c0_1 = arith.constant 0 : index
    %c0_2 = arith.constant 0 : index
    %1 = vector.load %arg2[%c0_1, %c0_2] : memref<128x128xbf16, #tpu.memory_space<vmem>>, vector<128x128xbf16>
    %cst = arith.constant dense<0.000000e+00> : vector<64x128xf32>
    %2 = tpu.matmul %0, %1, %cst {dimension_numbers = #tpu.dot_dimension_numbers<[1], [0], [0], [1], [0, 0, 1, 1], [], []>} : vector<64x128xbf16>, vector<128x128xbf16>, vector<64x128xf32> -> vector<64x128xf32>
    %3 = arith.truncf %2 : vector<64x128xf32> to vector<64x128xbf16>
    %c0_3 = arith.constant 0 : index
    %c0_4 = arith.constant 0 : index
    %4 = vector.load %arg3[%c0_3, %c0_4] : memref<64x128xbf16, #tpu.memory_space<vmem>>, vector<64x128xbf16>
    tpu.vector_store %arg3[%c0_3, %c0_4], %3 {strides = array<i32>} : memref<64x128xbf16, #tpu.memory_space<vmem>>, vector<64x128xbf16>,
    %cst_5 = arith.constant 0.000000e+00 : f32
    %5 = vector.broadcast %cst_5 : f32 to vector<8x128xf32>
    %c0_6 = arith.constant 0 : index
    %c0_7 = arith.constant 0 : index
    %6 = vector.load %arg4[%c0_6, %c0_7] : memref<8x128xf32, #tpu.memory_space<vmem>>, vector<8x128xf32>
    tpu.vector_store %arg4[%c0_6, %c0_7], %5 {strides = array<i32>} : memref<8x128xf32, #tpu.memory_space<vmem>>, vector<8x128xf32>,
    %cst_8 = arith.constant dense<0.000000e+00> : vector<128xf32>
    %7 = vector.multi_reduction <add>, %2, %cst_8 [0] : vector<64x128xf32> to vector<128xf32>
    %8 = vector.shape_cast %7 : vector<128xf32> to vector<1x128xf32>
    %c0_9 = arith.constant 0 : index
    %c0_10 = arith.constant 0 : index
    %9 = vector.load %arg4[%c0_9, %c0_10] : memref<8x128xf32, #tpu.memory_space<vmem>>, vector<1x128xf32>
    tpu.vector_store %arg4[%c0_9, %c0_10], %8 {strides = array<i32>} : memref<8x128xf32, #tpu.memory_space<vmem>>, vector<1x128xf32>,
    %10 = arith.mulf %2, %2 : vector<64x128xf32>
    %cst_11 = arith.constant dense<0.000000e+00> : vector<128xf32>
    %11 = vector.multi_reduction <add>, %10, %cst_11 [0] : vector<64x128xf32> to vector<128xf32>
    %12 = vector.shape_cast %11 : vector<128xf32> to vector<1x128xf32>
    %c1 = arith.constant 1 : index
    %c0_12 = arith.constant 0 : index
    %13 = vector.load %arg4[%c1, %c0_12] : memref<8x128xf32, #tpu.memory_space<vmem>>, vector<1x128xf32>
    tpu.vector_store %arg4[%c1, %c0_12], %12 {strides = array<i32>} : memref<8x128xf32, #tpu.memory_space<vmem>>, vector<1x128xf32>,
    return
  }
  func.func @transform_0(%arg0: i32) -> (i32, i32) {
    %c0_i32 = arith.constant 0 : i32
    %c0_i32_0 = arith.constant 0 : i32
    return %arg0, %c0_i32 : i32, i32
  }
  func.func @transform_1(%arg0: i32) -> (i32, i32) {
    %c0_i32 = arith.constant 0 : i32
    %c0_i32_0 = arith.constant 0 : i32
    %c0_i32_1 = arith.constant 0 : i32
    return %c0_i32, %c0_i32_0 : i32, i32
  }
  func.func @transform_2(%arg0: i32) -> (i32, i32) {
    %c0_i32 = arith.constant 0 : i32
    %c0_i32_0 = arith.constant 0 : i32
    return %arg0, %c0_i32 : i32, i32
  }
  func.func @transform_3(%arg0: i32) -> (i32, i32) {
    %c0_i32 = arith.constant 0 : i32
    %c0_i32_0 = arith.constant 0 : i32
    return %arg0, %c0_i32 : i32, i32
  }
}

module attributes {stable_mosaic.version = 11 : i64} {
  func.func @kernel(%arg0: i32, %arg1: memref<64x128xbf16, #tpu.memory_space<vmem>>, %arg2: memref<1x128xf32, #tpu.memory_space<vmem>>, %arg3: memref<1x128xf32, #tpu.memory_space<vmem>>, %arg4: memref<64x128xbf16, #tpu.memory_space<vmem>>) attributes {dimension_semantics = [#tpu.dimension_semantics<parallel>], iteration_bounds = array<i64: 2>, scalar_prefetch = 0 : i64, scratch_operands = 0 : i64, tpu.core_type = #tpu.core_type<tc>, window_params = [{transform_indices = @transform_0, window_bounds = array<i64: 64, 128>}, {pipeline_mode = #tpu.pipeline_mode<synchronous>, transform_indices = @transform_1, window_bounds = array<i64: 1, 128>}, {pipeline_mode = #tpu.pipeline_mode<synchronous>, transform_indices = @transform_2, window_bounds = array<i64: 1, 128>}, {transform_indices = @transform_3, window_bounds = array<i64: 64, 128>}]} {
    %c0 = arith.constant 0 : index
    %c0_0 = arith.constant 0 : index
    %0 = vector.load %arg1[%c0, %c0_0] : memref<64x128xbf16, #tpu.memory_space<vmem>>, vector<64x128xbf16>
    %1 = arith.extf %0 : vector<64x128xbf16> to vector<64x128xf32>
    %c0_1 = arith.constant 0 : index
    %c0_2 = arith.constant 0 : index
    %2 = vector.load %arg2[%c0_1, %c0_2] : memref<1x128xf32, #tpu.memory_space<vmem>>, vector<1x128xf32>
    %3 = vector.broadcast %2 : vector<1x128xf32> to vector<64x128xf32>
    %4 = arith.mulf %1, %3 : vector<64x128xf32>
    %c0_3 = arith.constant 0 : index
    %c0_4 = arith.constant 0 : index
    %5 = vector.load %arg3[%c0_3, %c0_4] : memref<1x128xf32, #tpu.memory_space<vmem>>, vector<1x128xf32>
    %6 = vector.broadcast %5 : vector<1x128xf32> to vector<64x128xf32>
    %7 = arith.addf %4, %6 : vector<64x128xf32>
    %cst = arith.constant 0.000000e+00 : f32
    %8 = vector.broadcast %cst : f32 to vector<64x128xf32>
    %9 = arith.maximumf %7, %8 : vector<64x128xf32>
    %10 = arith.truncf %9 : vector<64x128xf32> to vector<64x128xbf16>
    %c0_5 = arith.constant 0 : index
    %c0_6 = arith.constant 0 : index
    %11 = vector.load %arg4[%c0_5, %c0_6] : memref<64x128xbf16, #tpu.memory_space<vmem>>, vector<64x128xbf16>
    tpu.vector_store %arg4[%c0_5, %c0_6], %10 {strides = array<i32>} : memref<64x128xbf16, #tpu.memory_space<vmem>>, vector<64x128xbf16>,
    return
  }
  func.func @transform_0(%arg0: i32) -> (i32, i32) {
    %c0_i32 = arith.constant 0 : i32
    %c0_i32_0 = arith.constant 0 : i32
    return %arg0, %c0_i32 : i32, i32
  }
  func.func @transform_1(%arg0: i32) -> (i32, i32) {
    %c0_i32 = arith.constant 0 : i32
    %c0_i32_0 = arith.constant 0 : i32
    %c0_i32_1 = arith.constant 0 : i32
    return %c0_i32, %c0_i32_0 : i32, i32
  }
  func.func @transform_2(%arg0: i32) -> (i32, i32) {
    %c0_i32 = arith.constant 0 : i32
    %c0_i32_0 = arith.constant 0 : i32
    %c0_i32_1 = arith.constant 0 : i32
    return %c0_i32, %c0_i32_0 : i32, i32
  }
  func.func @transform_3(%arg0: i32) -> (i32, i32) {
    %c0_i32 = arith.constant 0 : i32
    %c0_i32_0 = arith.constant 0 : i32
    return %arg0, %c0_i32 : i32, i32
  }
}

module attributes {stable_mosaic.version = 11 : i64} {
  func.func @_matmul_stats_kernel(%arg0: i32, %arg1: memref<64x1152xbf16, #tpu.memory_space<vmem>>, %arg2: memref<1152x128xbf16, #tpu.memory_space<vmem>>, %arg3: memref<64x128xbf16, #tpu.memory_space<vmem>>, %arg4: memref<8x128xf32, #tpu.memory_space<vmem>>) attributes {dimension_semantics = [#tpu.dimension_semantics<parallel>], iteration_bounds = array<i64: 2>, scalar_prefetch = 0 : i64, scratch_operands = 0 : i64, tpu.core_type = #tpu.core_type<tc>, window_params = [{transform_indices = @transform_0, window_bounds = array<i64: 64, 1152>}, {pipeline_mode = #tpu.pipeline_mode<synchronous>, transform_indices = @transform_1, window_bounds = array<i64: 1152, 128>}, {transform_indices = @transform_2, window_bounds = array<i64: 64, 128>}, {transform_indices = @transform_3, window_bounds = array<i64: 8, 128>}]} {
    %c0 = arith.constant 0 : index
    %c0_0 = arith.constant 0 : index
    %0 = vector.load %arg1[%c0, %c0_0] : memref<64x1152xbf16, #tpu.memory_space<vmem>>, vector<64x1152xbf16>
    %c0_1 = arith.constant 0 : index
    %c0_2 = arith.constant 0 : index
    %1 = vector.load %arg2[%c0_1, %c0_2] : memref<1152x128xbf16, #tpu.memory_space<vmem>>, vector<1152x128xbf16>
    %cst = arith.constant dense<0.000000e+00> : vector<64x128xf32>
    %2 = tpu.matmul %0, %1, %cst {dimension_numbers = #tpu.dot_dimension_numbers<[1], [0], [0], [1], [0, 0, 1, 1], [], []>} : vector<64x1152xbf16>, vector<1152x128xbf16>, vector<64x128xf32> -> vector<64x128xf32>
    %3 = arith.truncf %2 : vector<64x128xf32> to vector<64x128xbf16>
    %c0_3 = arith.constant 0 : index
    %c0_4 = arith.constant 0 : index
    %4 = vector.load %arg3[%c0_3, %c0_4] : memref<64x128xbf16, #tpu.memory_space<vmem>>, vector<64x128xbf16>
    tpu.vector_store %arg3[%c0_3, %c0_4], %3 {strides = array<i32>} : memref<64x128xbf16, #tpu.memory_space<vmem>>, vector<64x128xbf16>,
    %cst_5 = arith.constant 0.000000e+00 : f32
    %5 = vector.broadcast %cst_5 : f32 to vector<8x128xf32>
    %c0_6 = arith.constant 0 : index
    %c0_7 = arith.constant 0 : index
    %6 = vector.load %arg4[%c0_6, %c0_7] : memref<8x128xf32, #tpu.memory_space<vmem>>, vector<8x128xf32>
    tpu.vector_store %arg4[%c0_6, %c0_7], %5 {strides = array<i32>} : memref<8x128xf32, #tpu.memory_space<vmem>>, vector<8x128xf32>,
    %cst_8 = arith.constant dense<0.000000e+00> : vector<128xf32>
    %7 = vector.multi_reduction <add>, %2, %cst_8 [0] : vector<64x128xf32> to vector<128xf32>
    %8 = vector.shape_cast %7 : vector<128xf32> to vector<1x128xf32>
    %c0_9 = arith.constant 0 : index
    %c0_10 = arith.constant 0 : index
    %9 = vector.load %arg4[%c0_9, %c0_10] : memref<8x128xf32, #tpu.memory_space<vmem>>, vector<1x128xf32>
    tpu.vector_store %arg4[%c0_9, %c0_10], %8 {strides = array<i32>} : memref<8x128xf32, #tpu.memory_space<vmem>>, vector<1x128xf32>,
    %10 = arith.mulf %2, %2 : vector<64x128xf32>
    %cst_11 = arith.constant dense<0.000000e+00> : vector<128xf32>
    %11 = vector.multi_reduction <add>, %10, %cst_11 [0] : vector<64x128xf32> to vector<128xf32>
    %12 = vector.shape_cast %11 : vector<128xf32> to vector<1x128xf32>
    %c1 = arith.constant 1 : index
    %c0_12 = arith.constant 0 : index
    %13 = vector.load %arg4[%c1, %c0_12] : memref<8x128xf32, #tpu.memory_space<vmem>>, vector<1x128xf32>
    tpu.vector_store %arg4[%c1, %c0_12], %12 {strides = array<i32>} : memref<8x128xf32, #tpu.memory_space<vmem>>, vector<1x128xf32>,
    return
  }
  func.func @transform_0(%arg0: i32) -> (i32, i32) {
    %c0_i32 = arith.constant 0 : i32
    %c0_i32_0 = arith.constant 0 : i32
    return %arg0, %c0_i32 : i32, i32
  }
  func.func @transform_1(%arg0: i32) -> (i32, i32) {
    %c0_i32 = arith.constant 0 : i32
    %c0_i32_0 = arith.constant 0 : i32
    %c0_i32_1 = arith.constant 0 : i32
    return %c0_i32, %c0_i32_0 : i32, i32
  }
  func.func @transform_2(%arg0: i32) -> (i32, i32) {
    %c0_i32 = arith.constant 0 : i32
    %c0_i32_0 = arith.constant 0 : i32
    return %arg0, %c0_i32 : i32, i32
  }
  func.func @transform_3(%arg0: i32) -> (i32, i32) {
    %c0_i32 = arith.constant 0 : i32
    %c0_i32_0 = arith.constant 0 : i32
    return %arg0, %c0_i32 : i32, i32
  }
}

module attributes {stable_mosaic.version = 11 : i64} {
  func.func @kernel(%arg0: i32, %arg1: memref<64x128xbf16, #tpu.memory_space<vmem>>, %arg2: memref<1x128xf32, #tpu.memory_space<vmem>>, %arg3: memref<1x128xf32, #tpu.memory_space<vmem>>, %arg4: memref<64x128xbf16, #tpu.memory_space<vmem>>, %arg5: memref<1x128xf32, #tpu.memory_space<vmem>>, %arg6: memref<1x128xf32, #tpu.memory_space<vmem>>, %arg7: memref<64x128xf32, #tpu.memory_space<vmem>>) attributes {dimension_semantics = [#tpu.dimension_semantics<parallel>], iteration_bounds = array<i64: 2>, scalar_prefetch = 0 : i64, scratch_operands = 0 : i64, tpu.core_type = #tpu.core_type<tc>, window_params = [{transform_indices = @transform_0, window_bounds = array<i64: 64, 128>}, {pipeline_mode = #tpu.pipeline_mode<synchronous>, transform_indices = @transform_1, window_bounds = array<i64: 1, 128>}, {pipeline_mode = #tpu.pipeline_mode<synchronous>, transform_indices = @transform_2, window_bounds = array<i64: 1, 128>}, {transform_indices = @transform_3, window_bounds = array<i64: 64, 128>}, {pipeline_mode = #tpu.pipeline_mode<synchronous>, transform_indices = @transform_4, window_bounds = array<i64: 1, 128>}, {pipeline_mode = #tpu.pipeline_mode<synchronous>, transform_indices = @transform_5, window_bounds = array<i64: 1, 128>}, {transform_indices = @transform_6, window_bounds = array<i64: 64, 128>}]} {
    %c0 = arith.constant 0 : index
    %c0_0 = arith.constant 0 : index
    %0 = vector.load %arg1[%c0, %c0_0] : memref<64x128xbf16, #tpu.memory_space<vmem>>, vector<64x128xbf16>
    %1 = arith.extf %0 : vector<64x128xbf16> to vector<64x128xf32>
    %c0_1 = arith.constant 0 : index
    %c0_2 = arith.constant 0 : index
    %2 = vector.load %arg2[%c0_1, %c0_2] : memref<1x128xf32, #tpu.memory_space<vmem>>, vector<1x128xf32>
    %3 = vector.broadcast %2 : vector<1x128xf32> to vector<64x128xf32>
    %4 = arith.mulf %1, %3 : vector<64x128xf32>
    %c0_3 = arith.constant 0 : index
    %c0_4 = arith.constant 0 : index
    %5 = vector.load %arg3[%c0_3, %c0_4] : memref<1x128xf32, #tpu.memory_space<vmem>>, vector<1x128xf32>
    %6 = vector.broadcast %5 : vector<1x128xf32> to vector<64x128xf32>
    %7 = arith.addf %4, %6 : vector<64x128xf32>
    %c0_5 = arith.constant 0 : index
    %c0_6 = arith.constant 0 : index
    %8 = vector.load %arg4[%c0_5, %c0_6] : memref<64x128xbf16, #tpu.memory_space<vmem>>, vector<64x128xbf16>
    %9 = arith.extf %8 : vector<64x128xbf16> to vector<64x128xf32>
    %c0_7 = arith.constant 0 : index
    %c0_8 = arith.constant 0 : index
    %10 = vector.load %arg5[%c0_7, %c0_8] : memref<1x128xf32, #tpu.memory_space<vmem>>, vector<1x128xf32>
    %11 = vector.broadcast %10 : vector<1x128xf32> to vector<64x128xf32>
    %12 = arith.mulf %9, %11 : vector<64x128xf32>
    %c0_9 = arith.constant 0 : index
    %c0_10 = arith.constant 0 : index
    %13 = vector.load %arg6[%c0_9, %c0_10] : memref<1x128xf32, #tpu.memory_space<vmem>>, vector<1x128xf32>
    %14 = vector.broadcast %13 : vector<1x128xf32> to vector<64x128xf32>
    %15 = arith.addf %12, %14 : vector<64x128xf32>
    %16 = arith.addf %7, %15 : vector<64x128xf32>
    %cst = arith.constant 0.000000e+00 : f32
    %17 = vector.broadcast %cst : f32 to vector<64x128xf32>
    %18 = arith.maximumf %16, %17 : vector<64x128xf32>
    %c0_11 = arith.constant 0 : index
    %c0_12 = arith.constant 0 : index
    %19 = vector.load %arg7[%c0_11, %c0_12] : memref<64x128xf32, #tpu.memory_space<vmem>>, vector<64x128xf32>
    tpu.vector_store %arg7[%c0_11, %c0_12], %18 {strides = array<i32>} : memref<64x128xf32, #tpu.memory_space<vmem>>, vector<64x128xf32>,
    return
  }
  func.func @transform_0(%arg0: i32) -> (i32, i32) {
    %c0_i32 = arith.constant 0 : i32
    %c0_i32_0 = arith.constant 0 : i32
    return %arg0, %c0_i32 : i32, i32
  }
  func.func @transform_1(%arg0: i32) -> (i32, i32) {
    %c0_i32 = arith.constant 0 : i32
    %c0_i32_0 = arith.constant 0 : i32
    %c0_i32_1 = arith.constant 0 : i32
    return %c0_i32, %c0_i32_0 : i32, i32
  }
  func.func @transform_2(%arg0: i32) -> (i32, i32) {
    %c0_i32 = arith.constant 0 : i32
    %c0_i32_0 = arith.constant 0 : i32
    %c0_i32_1 = arith.constant 0 : i32
    return %c0_i32, %c0_i32_0 : i32, i32
  }
  func.func @transform_3(%arg0: i32) -> (i32, i32) {
    %c0_i32 = arith.constant 0 : i32
    %c0_i32_0 = arith.constant 0 : i32
    return %arg0, %c0_i32 : i32, i32
  }
  func.func @transform_4(%arg0: i32) -> (i32, i32) {
    %c0_i32 = arith.constant 0 : i32
    %c0_i32_0 = arith.constant 0 : i32
    %c0_i32_1 = arith.constant 0 : i32
    return %c0_i32, %c0_i32_0 : i32, i32
  }
  func.func @transform_5(%arg0: i32) -> (i32, i32) {
    %c0_i32 = arith.constant 0 : i32
    %c0_i32_0 = arith.constant 0 : i32
    %c0_i32_1 = arith.constant 0 : i32
    return %c0_i32, %c0_i32_0 : i32, i32
  }
  func.func @transform_6(%arg0: i32) -> (i32, i32) {
    %c0_i32 = arith.constant 0 : i32
    %c0_i32_0 = arith.constant 0 : i32
    return %arg0, %c0_i32 : i32, i32
  }
}

</mosaic_0001>

<bundles_post_ra>
// kernel: basic_block_forward.5
= control target key start
LH: loop header
LB: loop body
LE: loop exit
PB: predicated region body
PF: predicated region fallthrough
CT: control target
= control target key end

     0   :  { %s676_s12 = smov 0   ;;  %s743_s0 = inlined_call_operand.vmem [shape: bf16[128,128], index: 0, kind: input, shape index: {}]   ;;  %s744_s1 = inlined_call_operand.vmem [shape: bf16[128,128], index: 1, kind: input, shape index: {}]   ;;  %s745_s2 = inlined_call_operand.vmem [shape: bf16[128,128], index: 2, kind: output, shape index: {0}]   ;;  %s746_s3 = inlined_call_operand.vmem [shape: f32[16,128], index: 3, kind: output, shape index: {1}]  }
   0x1 LB: > { %s682_s13 = sadd.s32 4294967295, %s653_s12   ;;  %p515_p0 = scmp.ge.s32.totalorder %s653_s12, 1  ;;  %s653_s12 = sphi %s676_s12, %s14_s12  }
   0x2   : > { %p141_p1 = scmp.lt.s32.totalorder %s653_s12, 3 }
   0x4   : > { %p142_p2 = pnand %p515_p0, %p141_p1 }
   0x5   : > { %s516_s16 = sshll.u32 (!%p142_p2), %s682_s13, 3  ;;  %p181_p4 = scmp.lt.s32.totalorder (!%p142_p2), %s682_s13, 1 }
   0x6   : > { %145 = sbr.rel (%p142_p2) target bundleno = 272 (0x110), region = 28  ;;  %p170_p3 = scmp.lt.s32.totalorder (!%p142_p2), %s516_s16, 15 }
   0xb   : > { %v635_v0 = vld [vmem:[%s744_s1 + $0x38] sm:$0xff]   ;;  %v636_v1 = vld [vmem:[%s744_s1 + $0x30] sm:$0xff]   ;;  %s748_s16 = smov (!%p170_p3, %s516_s16), 15  ;;  %v637_v2 = vld [vmem:[%s744_s1 + $0x28] sm:$0xff]   ;;  %s750_s13 = smov (!%p181_p4, %s682_s13), 1  ;;  %v655_v12 = vmov 0.0  }
   0xc   : > { %586 = vmatprep.subr.bf16.mxu0 %v635_v0  ;;  %610 = vmatprep.subr.bf16.mxu1 %v635_v0  ;;  %s517_s21 = sshll.u32 %s748_s16, 2  ;;  %v638_v3 = vld [vmem:[%s744_s1 + $0x20] sm:$0xff]   ;;  %v639_v6 = vld [vmem:[%s744_s1 + $0x18] sm:$0xff]   ;;  %v640_v7 = vld [vmem:[%s744_s1 + $0x10] sm:$0xff]   ;;  %s520_s8 = sshll.u32 %s750_s13, 3 }
   0xd   : > { %587 = vmatpush3.bf16.msra.mxu0 %v635_v0  ;;  %618 = vmatpush3.bf16.msra.mxu1 %v635_v0  ;;  %s704_s24 = scalar_lea.vmem %s743_s0, %s517_s21  ;;  %v641_v8 = vld [vmem:[%s744_s1 + $0x8] sm:$0xff]   ;;  %v642_v9 = vld [vmem:[%s744_s1] sm:$0xff]   ;;  %s730_s11 = scalar_lea.vmem %s746_s3, %s520_s8 }
   0xe   : > { %588 = vmatprep.subr.bf16.mxu0 %v636_v1  ;;  %611 = vmatprep.subr.bf16.mxu1 %v636_v1  ;;  %v643_v4 = vld [vmem:[%s704_s24] sm:$0xff]   ;;  %v645_v5 = vld [vmem:[%s704_s24 + $0x10] sm:$0xff]   ;;  %v644_v10 = vld [vmem:[%s704_s24 + $0x8] sm:$0xff]   ;;  %387 = vst [vmem:[%s730_s11] sm:$0xff] %v655_v12  ;;  %s179_s17 = scalar_lea.vmem %s745_s2, %s517_s21 }
   0xf   : > { %602 = vmatprep.mubr.bf16.mxu0 %v643_v4  ;;  %606 = vmatprep.mubr.bf16.mxu1 %v645_v5  ;;  %v646_v11 = vld [vmem:[%s704_s24 + $0x18] sm:$0xff]  }
  0x11   : > { %589 = vmatpush3.bf16.msra.mxu0 %v636_v1  ;;  %619 = vmatpush3.bf16.msra.mxu1 %v636_v1 }
  0x12   : > { %590 = vmatprep.subr.bf16.mxu0 %v637_v2  ;;  %612 = vmatprep.subr.bf16.mxu1 %v637_v2 }
  0x15   : > { %591 = vmatpush3.bf16.msra.mxu0 %v637_v2  ;;  %620 = vmatpush3.bf16.msra.mxu1 %v637_v2 }
  0x16   : > { %592 = vmatprep.subr.bf16.mxu0 %v638_v3  ;;  %613 = vmatprep.subr.bf16.mxu1 %v638_v3 }
  0x19   : > { %593 = vmatpush3.bf16.msra.mxu0 %v638_v3  ;;  %621 = vmatpush3.bf16.msra.mxu1 %v638_v3 }
  0x1a   : > { %594 = vmatprep.subr.bf16.mxu0 %v639_v6  ;;  %614 = vmatprep.subr.bf16.mxu1 %v639_v6 }
  0x1d   : > { %595 = vmatpush3.bf16.msra.mxu0 %v639_v6  ;;  %622 = vmatpush3.bf16.msra.mxu1 %v639_v6 }
  0x1e   : > { %596 = vmatprep.subr.bf16.mxu0 %v640_v7  ;;  %615 = vmatprep.subr.bf16.mxu1 %v640_v7 }
  0x21   : > { %597 = vmatpush3.bf16.msra.mxu0 %v640_v7  ;;  %623 = vmatpush3.bf16.msra.mxu1 %v640_v7 }
  0x22   : > { %598 = vmatprep.subr.bf16.mxu0 %v641_v8  ;;  %616 = vmatprep.subr.bf16.mxu1 %v641_v8 }
  0x25   : > { %599 = vmatpush3.bf16.msra.mxu0 %v641_v8  ;;  %624 = vmatpush3.bf16.msra.mxu1 %v641_v8 }
  0x26   : > { %600 = vmatprep.subr.bf16.mxu0 %v642_v9  ;;  %617 = vmatprep.subr.bf16.mxu1 %v642_v9 }
  0x29   : > { %601 = vmatpush3.bf16.msra.mxu0 %v642_v9  ;;  %625 = vmatpush3.bf16.msra.mxu1 %v642_v9 }
  0x2c   : > { %603 = vmatmul.mubr.bf16.vlgmr.msra.gmra.mxu0 %v644_v10  ;;  %607 = vmatmul.mubr.bf16.vlgmr.msra.gmra.mxu1 %v646_v11 }
  0xec   : > { %v604_v13 = vpop.f32.mrf.mxu0  ;;  %v608_v14 = vpop.f32.mrf.mxu1 }
  0xed   : > { %v404_v28 = vmul.f32 %v604_v13, %v604_v13  ;;  %v408_v40 = vmul.f32 %v608_v14, %v608_v14 }
  0xee   : > { %v316_v15 = vpop.f32.mrf.mxu0  ;;  %v332_v16 = vpop.f32.mrf.mxu1 }
  0xef   : > { %v402_v21 = vmul.f32 %v316_v15, %v316_v15  ;;  %v406_v34 = vmul.f32 %v332_v16, %v332_v16 }
  0xf0   : > { %v605_v17 = vpop.f32.mrf.mxu0  ;;  %v609_v18 = vpop.f32.mrf.mxu1 }
  0xf1   : > { %v559_v19 = vpack.c.bf16 %v605_v17, %v604_v13  ;;  %v569_v20 = vpack.c.bf16 %v609_v18, %v608_v14  ;;  %v405_v31 = vmul.f32 %v605_v17, %v605_v17  ;;  %v409_v43 = vmul.f32 %v609_v18, %v609_v18 }
  0xf2   : > { %v319_v22 = vpop.f32.mrf.mxu0  ;;  %v335_v23 = vpop.f32.mrf.mxu1 }
  0xf3   : > { %571 = vst [vmem:[%s179_s17 + $0x8] sm:$0xff] %v559_v19   ;;  %v554_v24 = vpack.c.bf16 %v319_v22, %v316_v15  ;;  %v388_v25 = vadd.f32 %v319_v22, %v316_v15  ;;  %v403_v26 = vmul.f32 %v319_v22, %v319_v22  ;;  %573 = vst [vmem:[%s179_s17 + $0x18] sm:$0xff] %v569_v20  }
  0xf4   : > { %v564_v27 = vpack.c.bf16 %v335_v23, %v332_v16  ;;  %v407_v38 = vmul.f32 %v335_v23, %v335_v23 }
  0xf5   : > { %555 = vst [vmem:[%s179_s17] sm:$0xff] %v554_v24   ;;  %v389_v29 = vadd.f32 %v604_v13, %v388_v25  ;;  %v410_v30 = vadd.f32 %v403_v26, %v402_v21 }
  0xf6   : > { %572 = vst [vmem:[%s179_s17 + $0x10] sm:$0xff] %v564_v27  }
  0xf7   : > { %v411_v32 = vadd.f32 %v410_v30, %v404_v28  ;;  %v390_v33 = vadd.f32 %v605_v17, %v389_v29 }
  0xf9   : > { %v391_v35 = vadd.f32 %v390_v33, %v332_v16  ;;  %v412_v36 = vadd.f32 %v411_v32, %v405_v31 }
  0xfb   : > { %v392_v37 = vadd.f32 %v391_v35, %v335_v23  ;;  %v413_v39 = vadd.f32 %v412_v36, %v406_v34 }
  0xfd   : > { %v393_v41 = vadd.f32 %v608_v14, %v392_v37  ;;  %v414_v42 = vadd.f32 %v413_v39, %v407_v38 }
  0xff   : > { %v394_v44 = vadd.f32 %v609_v18, %v393_v41  ;;  %v415_v45 = vadd.f32 %v414_v42, %v408_v40 }
 0x101   : > { %v395_v46 = vrot.slane %v394_v44, 4  ;;  %v416_v47 = vadd.f32 %v415_v45, %v409_v43 }
 0x103   : > { %v396_v48 = vadd.f32 %v395_v46, %v394_v44  ;;  %v417_v49 = vrot.slane %v416_v47, 4 }
 0x105   : > { %v397_v50 = vrot.slane %v396_v48, 2  ;;  %v418_v51 = vadd.f32 %v417_v49, %v416_v47 }
 0x107   : > { %v398_v52 = vadd.f32 %v397_v50, %v396_v48  ;;  %v419_v53 = vrot.slane %v418_v51, 2 }
 0x109   : > { %v399_v54 = vrot.slane %v398_v52, 1  ;;  %v420_v55 = vadd.f32 %v419_v53, %v418_v51 }
 0x10b   : > { %v400_v56 = vadd.f32 %v399_v54, %v398_v52  ;;  %v421_v57 = vrot.slane %v420_v55, 1 }
 0x10d   : > { %401 = vst [vmem:[%s730_s11] sm:$0x1] %v400_v56  ;;  %v422_v58 = vadd.f32 %v421_v57, %v420_v55 }
 0x10f   : > { %423 = vst [vmem:[%s730_s11 + $0x1] sm:$0x1] %v422_v58 }
 0x110 PF: > { %s14_s12 = sadd.s32 1, %s653_s12  }
 0x111   : > { %p11_p5 = scmp.ge.s32.totalorder %s14_s12, 4  }
 0x113   :  { %13 = sbr.rel (!%p11_p5) target bundleno = 1 (0x1), region = 70 }

// kernel: basic_block_forward.6
= control target key start
LH: loop header
LB: loop body
LE: loop exit
PB: predicated region body
PF: predicated region fallthrough
CT: control target
= control target key end

     0   :  { %s431_s12 = smov 0   ;;  %s461_s0 = inlined_call_operand.vmem [shape: bf16[128,128], index: 0, kind: input, shape index: {}]   ;;  %s462_s1 = inlined_call_operand.vmem [shape: f32[1,128], index: 1, kind: input, shape index: {}]   ;;  %s463_s2 = inlined_call_operand.vmem [shape: f32[1,128], index: 2, kind: input, shape index: {}]   ;;  %s464_s3 = inlined_call_operand.vmem [shape: bf16[128,128], index: 3, kind: output, shape index: {}]  }
   0x1 LB: > { %s324_s13 = sadd.s32 4294967295, %s409_s12   ;;  %p328_p0 = scmp.ge.s32.totalorder %s409_s12, 1  ;;  %s409_s12 = sphi %s431_s12, %s13_s12  }
   0x2   : > { %p138_p1 = scmp.lt.s32.totalorder %s409_s12, 3 }
   0x4   : > { %p139_p2 = pnand %p328_p0, %p138_p1 }
   0x5   : > { %s329_s14 = sshll.u32 (!%p139_p2), %s324_s13, 3 }
   0x6   : > { %142 = sbr.rel (%p139_p2) target bundleno = 27 (0x1b), region = 32  ;;  %p163_p3 = scmp.lt.s32.totalorder (!%p139_p2), %s329_s14, 15 }
   0xb   : > { %s466_s14 = smov (!%p163_p3, %s329_s14), 15  ;;  %v333_v0 = vld [vmem:[%s462_s1] ss:$0 sm:$0xff] }
   0xc   : > { %s330_s15 = sshll.u32 %s466_s14, 2  ;;  %v334_v9 = vld [vmem:[%s463_s2] ss:$0 sm:$0xff] }
   0xd   : > { %s166_s18 = scalar_lea.vmem %s461_s0, %s330_s15  ;;  %s172_s25 = scalar_lea.vmem %s464_s3, %s330_s15 }
   0xe   : > { %v354_v1 = vld [vmem:[%s166_s18] sm:$0xff]   ;;  %v389_v2 = vld [vmem:[%s166_s18 + $0x8] sm:$0xff]   ;;  %v390_v3 = vld [vmem:[%s166_s18 + $0x10] sm:$0xff]  }
   0xf   : > { %v355_v4 = vunpack.c.l.bf16 %v354_v1  ;;  %v356_v5 = vunpack.c.h.bf16 %v354_v1  ;;  %v359_v6 = vunpack.c.l.bf16 %v389_v2  ;;  %v360_v7 = vunpack.c.h.bf16 %v389_v2  ;;  %v391_v8 = vld [vmem:[%s166_s18 + $0x18] sm:$0xff]  }
  0x10   : > { %v363_v10 = vunpack.c.l.bf16 %v390_v3  ;;  %v364_v11 = vunpack.c.h.bf16 %v390_v3  ;;  %v367_v12 = vunpack.c.l.bf16 %v391_v8  ;;  %v368_v13 = vunpack.c.h.bf16 %v391_v8 }
  0x11   : > { %v197_v14 = vmul.f32 %v355_v4, %v333_v0  ;;  %v198_v15 = vmul.f32 %v356_v5, %v333_v0  ;;  %v199_v16 = vmul.f32 %v359_v6, %v333_v0  ;;  %v200_v17 = vmul.f32 %v360_v7, %v333_v0 }
  0x12   : > { %v201_v18 = vmul.f32 %v363_v10, %v333_v0  ;;  %v202_v19 = vmul.f32 %v364_v11, %v333_v0  ;;  %v203_v20 = vmul.f32 %v367_v12, %v333_v0  ;;  %v204_v21 = vmul.f32 %v368_v13, %v333_v0 }
  0x13   : > { %v212_v22 = vadd.f32 %v334_v9, %v197_v14  ;;  %v213_v23 = vadd.f32 %v334_v9, %v198_v15  ;;  %v214_v24 = vadd.f32 %v334_v9, %v199_v16  ;;  %v215_v25 = vadd.f32 %v334_v9, %v200_v17 }
  0x14   : > { %v216_v26 = vadd.f32 %v334_v9, %v201_v18  ;;  %v217_v27 = vadd.f32 %v334_v9, %v202_v19  ;;  %v218_v28 = vadd.f32 %v334_v9, %v203_v20  ;;  %v219_v29 = vadd.f32 %v334_v9, %v204_v21 }
  0x15   : > { %v220_v30 = vmax.f32 %v212_v22, 0.0  ;;  %v221_v31 = vmax.f32 %v213_v23, 0.0  ;;  %v222_v32 = vmax.f32 %v214_v24, 0.0  ;;  %v223_v33 = vmax.f32 %v215_v25, 0.0 }
  0x16   : > { %v224_v34 = vmax.f32 %v216_v26, 0.0  ;;  %v225_v35 = vmax.f32 %v217_v27, 0.0  ;;  %v226_v36 = vmax.f32 %v218_v28, 0.0  ;;  %v227_v37 = vmax.f32 %v219_v29, 0.0 }
  0x17   : > { %v372_v38 = vpack.c.bf16 %v221_v31, %v220_v30  ;;  %v377_v39 = vpack.c.bf16 %v223_v33, %v222_v32 }
  0x18   : > { %v382_v40 = vpack.c.bf16 %v225_v35, %v224_v34  ;;  %v387_v41 = vpack.c.bf16 %v227_v37, %v226_v36 }
  0x19   : > { %373 = vst [vmem:[%s172_s25] sm:$0xff] %v372_v38   ;;  %392 = vst [vmem:[%s172_s25 + $0x8] sm:$0xff] %v377_v39  }
  0x1a   : > { %393 = vst [vmem:[%s172_s25 + $0x10] sm:$0xff] %v382_v40   ;;  %394 = vst [vmem:[%s172_s25 + $0x18] sm:$0xff] %v387_v41  }
  0x1b PF: > { %s13_s12 = sadd.s32 1, %s409_s12  }
  0x1c   : > { %p10_p4 = scmp.ge.s32.totalorder %s13_s12, 4  }
  0x1e   :  { %12 = sbr.rel (!%p10_p4) target bundleno = 1 (0x1), region = 62 }

// kernel: basic_block_forward.9
= control target key start
LH: loop header
LB: loop body
LE: loop exit
PB: predicated region body
PF: predicated region fallthrough
CT: control target
= control target key end

     0   :  { %s567_s21 = smov 0   ;;  %s665_s0 = inlined_call_operand.vmem [shape: bf16[128,128], index: 0, kind: input, shape index: {}]   ;;  %s666_s1 = inlined_call_operand.vmem [shape: f32[1,128], index: 1, kind: input, shape index: {}]   ;;  %s667_s2 = inlined_call_operand.vmem [shape: f32[1,128], index: 2, kind: input, shape index: {}]   ;;  %s668_s3 = inlined_call_operand.vmem [shape: bf16[128,128], index: 3, kind: input, shape index: {}]   ;;  %s669_s4 = inlined_call_operand.vmem [shape: f32[1,128], index: 4, kind: input, shape index: {}]   ;;  %s670_s5 = inlined_call_operand.vmem [shape: f32[1,128], index: 5, kind: input, shape index: {}]   ;;  %s671_s6 = inlined_call_operand.vmem [shape: f32[128,128], index: 6, kind: output, shape index: {}]  }
   0x1 LB: > { %s461_s22 = sadd.s32 4294967295, %s530_s21   ;;  %p465_p0 = scmp.ge.s32.totalorder %s530_s21, 1  ;;  %s530_s21 = sphi %s567_s21, %s16_s21  }
   0x2   : > { %p224_p1 = scmp.lt.s32.totalorder %s530_s21, 3 }
   0x4   : > { %p225_p2 = pnand %p465_p0, %p224_p1 }
   0x5   : > { %s466_s23 = sshll.u32 (!%p225_p2), %s461_s22, 3 }
   0x6   : > { %228 = sbr.rel (%p225_p2) target bundleno = 37 (0x25), region = 44  ;;  %p260_p3 = scmp.lt.s32.totalorder (!%p225_p2), %s466_s23, 15 }
   0xb   : > { %s673_s23 = smov (!%p260_p3, %s466_s23), 15  ;;  %v591_v0 = vld [vmem:[%s666_s1] ss:$0 sm:$0xff] }
   0xc   : > { %s467_s24 = sshll.u32 %s673_s23, 2  ;;  %v596_v1 = vld [vmem:[%s669_s4] ss:$0 sm:$0xff]  ;;  %s471_s15 = sshll.u32 %s673_s23, 3 }
   0xd   : > { %s581_s27 = scalar_lea.vmem %s665_s0, %s467_s24  ;;  %s586_s30 = scalar_lea.vmem %s668_s3, %s467_s24  ;;  %v605_v10 = vld [vmem:[%s667_s2] ss:$0 sm:$0xff] }
   0xe   : > { %v479_v2 = vld [vmem:[%s581_s27] sm:$0xff]   ;;  %v510_v4 = vld [vmem:[%s581_s27 + $0x8] sm:$0xff]   ;;  %v511_v24 = vld [vmem:[%s581_s27 + $0x10] sm:$0xff]   ;;  %s634_s18 = scalar_lea.vmem %s671_s6, %s471_s15 }
   0xf   : > { %v495_v3 = vld [vmem:[%s586_s30] sm:$0xff]   ;;  %v480_v5 = vunpack.c.l.bf16 %v479_v2  ;;  %v481_v7 = vunpack.c.h.bf16 %v479_v2  ;;  %v513_v9 = vld [vmem:[%s586_s30 + $0x8] sm:$0xff]   ;;  %v484_v12 = vunpack.c.l.bf16 %v510_v4  ;;  %v485_v14 = vunpack.c.h.bf16 %v510_v4  ;;  %v514_v25 = vld [vmem:[%s586_s30 + $0x10] sm:$0xff]  }
  0x10   : > { %v496_v6 = vunpack.c.l.bf16 %v495_v3  ;;  %v497_v8 = vunpack.c.h.bf16 %v495_v3  ;;  %v610_v11 = vld [vmem:[%s670_s5] ss:$0 sm:$0xff]  ;;  %v500_v13 = vunpack.c.l.bf16 %v513_v9  ;;  %v501_v15 = vunpack.c.h.bf16 %v513_v9  ;;  %v512_v42 = vld [vmem:[%s581_s27 + $0x18] sm:$0xff]  }
  0x11   : > { %v300_v16 = vmul.f32 %v480_v5, %v591_v0  ;;  %v301_v18 = vmul.f32 %v481_v7, %v591_v0  ;;  %v302_v20 = vmul.f32 %v484_v12, %v591_v0  ;;  %v303_v22 = vmul.f32 %v485_v14, %v591_v0  ;;  %v515_v43 = vld [vmem:[%s586_s30 + $0x18] sm:$0xff]  }
  0x12   : > { %v346_v17 = vmul.f32 %v496_v6, %v596_v1  ;;  %v347_v19 = vmul.f32 %v497_v8, %v596_v1  ;;  %v348_v21 = vmul.f32 %v500_v13, %v596_v1  ;;  %v349_v23 = vmul.f32 %v501_v15, %v596_v1 }
  0x13   : > { %v315_v26 = vadd.f32 %v605_v10, %v300_v16  ;;  %v316_v28 = vadd.f32 %v605_v10, %v301_v18  ;;  %v317_v30 = vadd.f32 %v605_v10, %v302_v20  ;;  %v318_v32 = vadd.f32 %v605_v10, %v303_v22 }
  0x14   : > { %v361_v27 = vadd.f32 %v610_v11, %v346_v17  ;;  %v362_v29 = vadd.f32 %v610_v11, %v347_v19  ;;  %v363_v31 = vadd.f32 %v610_v11, %v348_v21  ;;  %v364_v33 = vadd.f32 %v610_v11, %v349_v23 }
  0x15   : > { %v488_v36 = vunpack.c.l.bf16 %v511_v24  ;;  %v504_v37 = vunpack.c.l.bf16 %v514_v25  ;;  %v489_v40 = vunpack.c.h.bf16 %v511_v24  ;;  %v505_v41 = vunpack.c.h.bf16 %v514_v25 }
  0x16   : > { %v369_v34 = vadd.f32 %v361_v27, %v315_v26  ;;  %v370_v35 = vadd.f32 %v362_v29, %v316_v28  ;;  %v371_v38 = vadd.f32 %v363_v31, %v317_v30  ;;  %v372_v39 = vadd.f32 %v364_v33, %v318_v32 }
  0x17   : > { %v304_v46 = vmul.f32 %v488_v36, %v591_v0  ;;  %v350_v47 = vmul.f32 %v504_v37, %v596_v1  ;;  %v305_v50 = vmul.f32 %v489_v40, %v591_v0  ;;  %v351_v51 = vmul.f32 %v505_v41, %v596_v1 }
  0x18   : > { %v377_v44 = vmax.f32 %v369_v34, 0.0  ;;  %v378_v45 = vmax.f32 %v370_v35, 0.0  ;;  %v379_v48 = vmax.f32 %v371_v38, 0.0  ;;  %v380_v49 = vmax.f32 %v372_v39, 0.0 }
  0x19   : > { %v319_v52 = vadd.f32 %v605_v10, %v304_v46  ;;  %v365_v53 = vadd.f32 %v610_v11, %v350_v47  ;;  %v492_v54 = vunpack.c.l.bf16 %v512_v42  ;;  %v508_v55 = vunpack.c.l.bf16 %v515_v43 }
  0x1a   : > { %385 = vst [vmem:[%s634_s18] sm:$0xff] %v377_v44  ;;  %386 = vst [vmem:[%s634_s18 + $0x8] sm:$0xff] %v378_v45  ;;  %v320_v56 = vadd.f32 %v605_v10, %v305_v50  ;;  %v366_v57 = vadd.f32 %v610_v11, %v351_v51  ;;  %v493_v58 = vunpack.c.h.bf16 %v512_v42  ;;  %v509_v59 = vunpack.c.h.bf16 %v515_v43 }
  0x1b   : > { %387 = vst [vmem:[%s634_s18 + $0x10] sm:$0xff] %v379_v48  ;;  %388 = vst [vmem:[%s634_s18 + $0x18] sm:$0xff] %v380_v49  ;;  %v373_v60 = vadd.f32 %v365_v53, %v319_v52  ;;  %v306_v61 = vmul.f32 %v492_v54, %v591_v0  ;;  %v352_v62 = vmul.f32 %v508_v55, %v596_v1 }
  0x1c   : > { %v374_v63 = vadd.f32 %v366_v57, %v320_v56  ;;  %v307_v2 = vmul.f32 %v493_v58, %v591_v0  ;;  %v353_v3 = vmul.f32 %v509_v59, %v596_v1 }
  0x1d   : > { %v381_v4 = vmax.f32 %v373_v60, 0.0  ;;  %v321_v5 = vadd.f32 %v605_v10, %v306_v61  ;;  %v367_v6 = vadd.f32 %v610_v11, %v352_v62 }
  0x1e   : > { %v382_v7 = vmax.f32 %v374_v63, 0.0  ;;  %v322_v8 = vadd.f32 %v605_v10, %v307_v2  ;;  %v368_v9 = vadd.f32 %v610_v11, %v353_v3 }
  0x1f   : > { %389 = vst [vmem:[%s634_s18 + $0x20] sm:$0xff] %v381_v4  ;;  %v375_v12 = vadd.f32 %v367_v6, %v321_v5 }
  0x20   : > { %390 = vst [vmem:[%s634_s18 + $0x28] sm:$0xff] %v382_v7  ;;  %v376_v13 = vadd.f32 %v368_v9, %v322_v8 }
  0x21   : > { %v383_v14 = vmax.f32 %v375_v12, 0.0 }
  0x22   : > { %v384_v15 = vmax.f32 %v376_v13, 0.0 }
  0x23   : > { %391 = vst [vmem:[%s634_s18 + $0x30] sm:$0xff] %v383_v14 }
  0x24   : > { %392 = vst [vmem:[%s634_s18 + $0x38] sm:$0xff] %v384_v15 }
  0x25 PF: > { %s16_s21 = sadd.s32 1, %s530_s21  }
  0x26   : > { %p13_p4 = scmp.ge.s32.totalorder %s16_s21, 4  }
  0x28   :  { %15 = sbr.rel (!%p13_p4) target bundleno = 1 (0x1), region = 77 }

// kernel: basic_block_forward.7
= control target key start
LH: loop header
LB: loop body
LE: loop exit
PB: predicated region body
PF: predicated region fallthrough
CT: control target
= control target key end

     0   :  { %s2012_s12 = smov 0   ;;  %s2312_s0 = inlined_call_operand.vmem [shape: bf16[128,1152], index: 0, kind: input, shape index: {}]   ;;  %s2313_s1 = inlined_call_operand.vmem [shape: bf16[1152,128], index: 1, kind: input, shape index: {}]   ;;  %s2314_s2 = inlined_call_operand.vmem [shape: bf16[128,128], index: 2, kind: output, shape index: {0}]   ;;  %s2315_s3 = inlined_call_operand.vmem [shape: f32[16,128], index: 3, kind: output, shape index: {1}]  }
   0x1 LB: > { %s2018_s13 = sadd.s32 4294967295, %s1989_s12   ;;  %p1482_p0 = scmp.ge.s32.totalorder %s1989_s12, 1  ;;  %s1989_s12 = sphi %s2012_s12, %s14_s12  }
   0x2   : > { %p142_p1 = scmp.lt.s32.totalorder %s1989_s12, 3 }
   0x4   : > { %p143_p2 = pnand %p1482_p0, %p142_p1 }
   0x6   : > { %146 = sbr.rel (%p143_p2) target bundleno = 340 (0x154), region = 28 }
   0xb   : > { %v1859_v0 = vld [vmem:[%s2313_s1 + $0x78] sm:$0xff]   ;;  %v1863_v4 = vld [vmem:[%s2313_s1 + $0x70] sm:$0xff]   ;;  %v1867_v8 = vld [vmem:[%s2313_s1 + $0x68] sm:$0xff]   ;;  %s1483_s19 = sshll.u32 %s2018_s13, 3  ;;  %p184_p4 = scmp.lt.s32.totalorder %s2018_s13, 1 }
   0xc   : > { %v1860_v1 = vld [vmem:[%s2313_s1 + $0xf8] sm:$0xff]   ;;  %1637 = vmatprep.subr.bf16.mxu0 %v1859_v0  ;;  %v1864_v5 = vld [vmem:[%s2313_s1 + $0xf0] sm:$0xff]   ;;  %v1868_v9 = vld [vmem:[%s2313_s1 + $0xe8] sm:$0xff]   ;;  %p172_p3 = scmp.lt.s32.totalorder %s1483_s19, 15 }
   0xd   : > { %v1861_v2 = vld [vmem:[%s2313_s1 + $0x38] sm:$0xff]   ;;  %1677 = vmatprep.subr.bf16.mxu1 %v1860_v1  ;;  %v1865_v6 = vld [vmem:[%s2313_s1 + $0x30] sm:$0xff]   ;;  %v1869_v10 = vld [vmem:[%s2313_s1 + $0x28] sm:$0xff]   ;;  %s2327_s13 = smov (!%p184_p4, %s2018_s13), 1 }
   0xe   : > { %v1862_v3 = vld [vmem:[%s2313_s1 + $0xb8] sm:$0xff]   ;;  %1638 = vmatpush3.bf16.msra.mxu0 %v1861_v2  ;;  %v1866_v7 = vld [vmem:[%s2313_s1 + $0xb0] sm:$0xff]   ;;  %v1870_v11 = vld [vmem:[%s2313_s1 + $0xa8] sm:$0xff]   ;;  %s2325_s19 = smov (!%p172_p3, %s1483_s19), 15  ;;  %s1487_s21 = sshll.u32 %s2327_s13, 3 }
   0xf   : > { %1678 = vmatpush3.bf16.msra.mxu1 %v1862_v3  ;;  %1639 = vmatprep.subr.bf16.mxu0 %v1863_v4  ;;  %v1871_v12 = vld [vmem:[%s2313_s1 + $0x60] sm:$0xff]   ;;  %v1875_v16 = vld [vmem:[%s2313_s1 + $0x58] sm:$0xff]   ;;  %v1879_v20 = vld [vmem:[%s2313_s1 + $0x50] sm:$0xff]   ;;  %s1849_s17 = smul.u32 36, %s2325_s19  ;;  %s2288_s24 = scalar_lea.vmem %s2315_s3, %s1487_s21 }
  0x10   : > { %1679 = vmatprep.subr.bf16.mxu1 %v1864_v5  ;;  %v1872_v13 = vld [vmem:[%s2313_s1 + $0xe0] sm:$0xff]   ;;  %v1876_v17 = vld [vmem:[%s2313_s1 + $0xd8] sm:$0xff]   ;;  %v1880_v21 = vld [vmem:[%s2313_s1 + $0xd0] sm:$0xff]   ;;  %s1486_s13 = sshll.u32 %s2325_s19, 2 }
  0x11   : > { %v1873_v14 = vld [vmem:[%s2313_s1 + $0x20] sm:$0xff]   ;;  %v1877_v18 = vld [vmem:[%s2313_s1 + $0x18] sm:$0xff]   ;;  %v1881_v22 = vld [vmem:[%s2313_s1 + $0x10] sm:$0xff]   ;;  %s2119_s29 = scalar_lea.vmem %s2312_s0, %s1849_s17  ;;  %s182_s26 = scalar_lea.vmem %s2314_s2, %s1486_s13 }
  0x12   : > { %1640 = vmatpush3.bf16.msra.mxu0 %v1865_v6  ;;  %v1874_v15 = vld [vmem:[%s2313_s1 + $0xa0] sm:$0xff]   ;;  %v1878_v19 = vld [vmem:[%s2313_s1 + $0x98] sm:$0xff]   ;;  %v1882_v23 = vld [vmem:[%s2313_s1 + $0x90] sm:$0xff]  }
  0x13   : > { %1680 = vmatpush3.bf16.msra.mxu1 %v1866_v7  ;;  %1641 = vmatprep.subr.bf16.mxu0 %v1867_v8  ;;  %v1883_v24 = vld [vmem:[%s2313_s1 + $0x48] sm:$0xff]   ;;  %v1887_v28 = vld [vmem:[%s2313_s1 + $0x40] sm:$0xff]   ;;  %v1897_v36 = vld [vmem:[%s2313_s1 + $0x178] sm:$0xff]  }
  0x14   : > { %1681 = vmatprep.subr.bf16.mxu1 %v1868_v9  ;;  %v1884_v25 = vld [vmem:[%s2313_s1 + $0xc8] sm:$0xff]   ;;  %v1888_v29 = vld [vmem:[%s2313_s1 + $0xc0] sm:$0xff]   ;;  %v1898_v37 = vld [vmem:[%s2313_s1 + $0x1f8] sm:$0xff]  }
  0x15   : > { %v1885_v26 = vld [vmem:[%s2313_s1 + $0x8] sm:$0xff]   ;;  %v1889_v30 = vld [vmem:[%s2313_s1] sm:$0xff]   ;;  %v1899_v38 = vld [vmem:[%s2313_s1 + $0x138] sm:$0xff]  }
  0x16   : > { %1642 = vmatpush3.bf16.msra.mxu0 %v1869_v10  ;;  %v1886_v27 = vld [vmem:[%s2313_s1 + $0x88] sm:$0xff]   ;;  %v1890_v31 = vld [vmem:[%s2313_s1 + $0x80] sm:$0xff]   ;;  %v1900_v39 = vld [vmem:[%s2313_s1 + $0x1b8] sm:$0xff]  }
  0x17   : > { %1682 = vmatpush3.bf16.msra.mxu1 %v1870_v11  ;;  %1643 = vmatprep.subr.bf16.mxu0 %v1871_v12  ;;  %v1891_v32 = vld [vmem:[%s2119_s29] ss:$36 sps:$4 sm:$0xff]   ;;  %v1894_v34 = vld [vmem:[%s2119_s29 + $0x8] ss:$36 sps:$4 sm:$0xff]   ;;  %v1901_v40 = vld [vmem:[%s2313_s1 + $0x170] sm:$0xff]  }
  0x18   : > { %1683 = vmatprep.subr.bf16.mxu1 %v1872_v13  ;;  %v1893_v33 = vld [vmem:[%s2119_s29 + $0x4] ss:$36 sps:$4 sm:$0xff]   ;;  %v1896_v35 = vld [vmem:[%s2119_s29 + $0xc] ss:$36 sps:$4 sm:$0xff]   ;;  %v1907_v45 = vld [vmem:[%s2119_s29 + $0x54] ss:$36 sps:$4 sm:$0xff]  }
  0x19   : > { %1021 = vmatprep.mubr.bf16.mxu0 %v1893_v33  ;;  %1086 = vmatprep.mubr.bf16.mxu1 %v1896_v35  ;;  %v1902_v41 = vld [vmem:[%s2313_s1 + $0x1f0] sm:$0xff]   ;;  %v1909_v46 = vld [vmem:[%s2119_s29 + $0x48] ss:$36 sps:$4 sm:$0xff]   ;;  %v1915_v52 = vld [vmem:[%s2313_s1 + $0x160] sm:$0xff]  }
  0x1a   : > { %1644 = vmatpush3.bf16.msra.mxu0 %v1873_v14  ;;  %v1903_v42 = vld [vmem:[%s2313_s1 + $0x130] sm:$0xff]   ;;  %v1911_v48 = vld [vmem:[%s2313_s1 + $0x168] sm:$0xff]   ;;  %v1916_v53 = vld [vmem:[%s2313_s1 + $0x1e0] sm:$0xff]  }
  0x1b   : > { %1684 = vmatpush3.bf16.msra.mxu1 %v1874_v15  ;;  %1645 = vmatprep.subr.bf16.mxu0 %v1875_v16  ;;  %v1904_v43 = vld [vmem:[%s2313_s1 + $0x1b0] sm:$0xff]   ;;  %v1912_v49 = vld [vmem:[%s2313_s1 + $0x1e8] sm:$0xff]   ;;  %v1917_v54 = vld [vmem:[%s2313_s1 + $0x120] sm:$0xff]  }
  0x1c   : > { %1685 = vmatprep.subr.bf16.mxu1 %v1876_v17  ;;  %v1905_v44 = vld [vmem:[%s2119_s29 + $0x4c] ss:$36 sps:$4 sm:$0xff]   ;;  %v1918_v55 = vld [vmem:[%s2313_s1 + $0x1a0] sm:$0xff]   ;;  %v1919_v56 = vld [vmem:[%s2119_s29 + $0x94] ss:$36 sps:$4 sm:$0xff]  }
  0x1d   : > { %v1910_v47 = vld [vmem:[%s2119_s29 + $0x50] ss:$36 sps:$4 sm:$0xff]   ;;  %v1913_v50 = vld [vmem:[%s2313_s1 + $0x128] sm:$0xff]   ;;  %v1921_v57 = vld [vmem:[%s2119_s29 + $0x9c] ss:$36 sps:$4 sm:$0xff]  }
  0x1e   : > { %1646 = vmatpush3.bf16.msra.mxu0 %v1877_v18  ;;  %v1914_v51 = vld [vmem:[%s2313_s1 + $0x1a8] sm:$0xff]   ;;  %v1923_v58 = vld [vmem:[%s2119_s29 + $0x90] ss:$36 sps:$4 sm:$0xff]   ;;  %v1924_v59 = vld [vmem:[%s2119_s29 + $0x98] ss:$36 sps:$4 sm:$0xff]  }
  0x1f   : > { %1686 = vmatpush3.bf16.msra.mxu1 %v1878_v19  ;;  %1647 = vmatprep.subr.bf16.mxu0 %v1879_v20  ;;  %v1925_v60 = vld [vmem:[%s2313_s1 + $0x158] sm:$0xff]   ;;  %v1929_v0 = vld [vmem:[%s2313_s1 + $0x150] sm:$0xff]   ;;  %v1935_v5 = vld [vmem:[%s2119_s29 + $0xe4] ss:$36 sps:$4 sm:$0xff]  }
  0x20   : > { %1687 = vmatprep.subr.bf16.mxu1 %v1880_v21  ;;  %v1926_v61 = vld [vmem:[%s2313_s1 + $0x1d8] sm:$0xff]   ;;  %v1930_v1 = vld [vmem:[%s2313_s1 + $0x1d0] sm:$0xff]   ;;  %v1938_v7 = vld [vmem:[%s2119_s29 + $0xe0] ss:$36 sps:$4 sm:$0xff]  }
  0x21   : > { %v1927_v62 = vld [vmem:[%s2313_s1 + $0x118] sm:$0xff]   ;;  %v1931_v2 = vld [vmem:[%s2313_s1 + $0x110] sm:$0xff]   ;;  %v1939_v8 = vld [vmem:[%s2313_s1 + $0x148] sm:$0xff]  }
  0x22   : > { %1648 = vmatpush3.bf16.msra.mxu0 %v1881_v22  ;;  %v1928_v63 = vld [vmem:[%s2313_s1 + $0x198] sm:$0xff]   ;;  %v1932_v3 = vld [vmem:[%s2313_s1 + $0x190] sm:$0xff]   ;;  %v1940_v9 = vld [vmem:[%s2313_s1 + $0x1c8] sm:$0xff]  }
  0x23   : > { %1688 = vmatpush3.bf16.msra.mxu1 %v1882_v23  ;;  %1649 = vmatprep.subr.bf16.mxu0 %v1883_v24  ;;  %v1933_v4 = vld [vmem:[%s2119_s29 + $0xdc] ss:$36 sps:$4 sm:$0xff]   ;;  %v1941_v10 = vld [vmem:[%s2313_s1 + $0x108] sm:$0xff]   ;;  %v1947_v16 = vld [vmem:[%s2119_s29 + $0x10] ss:$36 sps:$4 sm:$0xff]  }
  0x24   : > { %1689 = vmatprep.subr.bf16.mxu1 %v1884_v25  ;;  %v1937_v6 = vld [vmem:[%s2119_s29 + $0xd8] ss:$36 sps:$4 sm:$0xff]   ;;  %v1942_v11 = vld [vmem:[%s2313_s1 + $0x188] sm:$0xff]   ;;  %v1943_v12 = vld [vmem:[%s2313_s1 + $0x140] sm:$0xff]  }
  0x25   : > { %v1944_v13 = vld [vmem:[%s2313_s1 + $0x1c0] sm:$0xff]   ;;  %v1949_v17 = vld [vmem:[%s2119_s29 + $0x14] ss:$36 sps:$4 sm:$0xff]   ;;  %v1971_v33 = vld [vmem:[%s2119_s29 + $0xec] ss:$36 sps:$4 sm:$0xff]  }
  0x26   : > { %1650 = vmatpush3.bf16.msra.mxu0 %v1885_v26  ;;  %v1945_v14 = vld [vmem:[%s2313_s1 + $0x100] sm:$0xff]   ;;  %v1950_v18 = vld [vmem:[%s2119_s29 + $0x18] ss:$36 sps:$4 sm:$0xff]   ;;  %v1954_v21 = vld [vmem:[%s2313_s1 + $0x230] sm:$0xff]  }
  0x27   : > { %1690 = vmatpush3.bf16.msra.mxu1 %v1886_v27  ;;  %1651 = vmatprep.subr.bf16.mxu0 %v1887_v28  ;;  %v1946_v15 = vld [vmem:[%s2313_s1 + $0x180] sm:$0xff]   ;;  %v1953_v20 = vld [vmem:[%s2313_s1 + $0x238] sm:$0xff]   ;;  %v1961_v26 = vld [vmem:[%s2313_s1 + $0x228] sm:$0xff]  }
  0x28   : > { %1691 = vmatprep.subr.bf16.mxu1 %v1888_v29  ;;  %v1952_v19 = vld [vmem:[%s2119_s29 + $0x1c] ss:$36 sps:$4 sm:$0xff]   ;;  %v1957_v23 = vld [vmem:[%s2119_s29 + $0x64] ss:$36 sps:$4 sm:$0xff]   ;;  %v1965_v28 = vld [vmem:[%s2119_s29 + $0xac] ss:$36 sps:$4 sm:$0xff]  }
  0x29   : > { %v1955_v22 = vld [vmem:[%s2119_s29 + $0x5c] ss:$36 sps:$4 sm:$0xff]   ;;  %v1963_v27 = vld [vmem:[%s2119_s29 + $0xa4] ss:$36 sps:$4 sm:$0xff]   ;;  %v1970_v35 = vld [vmem:[%s2313_s1 + $0x210] sm:$0xff]  }
  0x2a   : > { %1652 = vmatpush3.bf16.msra.mxu0 %v1889_v30  ;;  %v1959_v24 = vld [vmem:[%s2119_s29 + $0x58] ss:$36 sps:$4 sm:$0xff]   ;;  %v1960_v25 = vld [vmem:[%s2119_s29 + $0x60] ss:$36 sps:$4 sm:$0xff]  }
  0x2b   : > { %1692 = vmatpush3.bf16.msra.mxu1 %v1890_v31  ;;  %1717 = vmatprep.subr.bf16.mxu0 %v1897_v36  ;;  %v1962_v29 = vld [vmem:[%s2313_s1 + $0x220] sm:$0xff]   ;;  %v1968_v31 = vld [vmem:[%s2119_s29 + $0xa8] ss:$36 sps:$4 sm:$0xff]  }
  0x2c   : > { %1757 = vmatprep.subr.bf16.mxu1 %v1898_v37  ;;  %v1967_v30 = vld [vmem:[%s2119_s29 + $0xa0] ss:$36 sps:$4 sm:$0xff]   ;;  %v1975_v36 = vld [vmem:[%s2119_s29 + $0xe8] ss:$36 sps:$4 sm:$0xff]  }
  0x2d   : > { %1022 = vmatmul.mubr.bf16.vlgmr.msra.gmra.mxu0 %v1891_v32  ;;  %v1969_v32 = vld [vmem:[%s2313_s1 + $0x218] sm:$0xff]   ;;  %v1977_v37 = vld [vmem:[%s2313_s1 + $0x208] sm:$0xff]  }
  0x2e   : > { %1087 = vmatmul.mubr.bf16.vlgmr.msra.gmra.mxu1 %v1894_v34  ;;  %1718 = vmatpush3.bf16.msra.mxu0 %v1899_v38  ;;  %v1973_v34 = vld [vmem:[%s2119_s29 + $0xf4] ss:$36 sps:$4 sm:$0xff]  }
  0x2f   : > { %1758 = vmatpush3.bf16.msra.mxu1 %v1900_v39  ;;  %1719 = vmatprep.subr.bf16.mxu0 %v1901_v40  ;;  %v1976_v38 = vld [vmem:[%s2119_s29 + $0xf0] ss:$36 sps:$4 sm:$0xff]   ;;  %v1979_v39 = vld [vmem:[%s2119_s29 + $0x20] ss:$36 sps:$4 sm:$0xff]  }
  0x30   : > { %1759 = vmatprep.subr.bf16.mxu1 %v1902_v41  ;;  %1029 = vmatprep.mubr.bf16.mxu0 %v1905_v44  ;;  %v1980_v40 = vld [vmem:[%s2119_s29 + $0xb0] ss:$36 sps:$4 sm:$0xff]   ;;  %v1978_v41 = vld [vmem:[%s2313_s1 + $0x200] sm:$0xff]   ;;  %v1991_v44 = vmov 0.0  }
  0x31   : > { %1094 = vmatprep.mubr.bf16.mxu1 %v1907_v45  ;;  %1354 = vst [vmem:[%s2288_s24] sm:$0xff] %v1991_v44 }
  0x32   : > { %1720 = vmatpush3.bf16.msra.mxu0 %v1903_v42  ;;  %v1981_v42 = vld [vmem:[%s2119_s29 + $0x68] ss:$36 sps:$4 sm:$0xff]  }
  0x33   : > { %1760 = vmatpush3.bf16.msra.mxu1 %v1904_v43  ;;  %1721 = vmatprep.subr.bf16.mxu0 %v1911_v48  ;;  %v1982_v43 = vld [vmem:[%s2119_s29 + $0xf8] ss:$36 sps:$4 sm:$0xff]  }
  0x34   : > { %1761 = vmatprep.subr.bf16.mxu1 %v1912_v49 }
  0x35   : > { %1030 = vmatmul.mubr.bf16.gmra.mxu0 %v1909_v46 }
  0x36   : > { %1095 = vmatmul.mubr.bf16.gmra.mxu1 %v1910_v47  ;;  %1722 = vmatpush3.bf16.msra.mxu0 %v1913_v50 }
  0x37   : > { %1762 = vmatpush3.bf16.msra.mxu1 %v1914_v51  ;;  %1723 = vmatprep.subr.bf16.mxu0 %v1915_v52 }
  0x38   : > { %1763 = vmatprep.subr.bf16.mxu1 %v1916_v53  ;;  %1037 = vmatprep.mubr.bf16.mxu0 %v1919_v56 }
  0x39   : > { %1102 = vmatprep.mubr.bf16.mxu1 %v1921_v57 }
  0x3a   : > { %1724 = vmatpush3.bf16.msra.mxu0 %v1917_v54 }
  0x3b   : > { %1764 = vmatpush3.bf16.msra.mxu1 %v1918_v55  ;;  %1725 = vmatprep.subr.bf16.mxu0 %v1925_v60 }
  0x3c   : > { %1765 = vmatprep.subr.bf16.mxu1 %v1926_v61 }
  0x3d   : > { %1038 = vmatmul.mubr.bf16.gmra.mxu0 %v1923_v58 }
  0x3e   : > { %1103 = vmatmul.mubr.bf16.gmra.mxu1 %v1924_v59  ;;  %1726 = vmatpush3.bf16.msra.mxu0 %v1927_v62 }
  0x3f   : > { %1766 = vmatpush3.bf16.msra.mxu1 %v1928_v63  ;;  %1727 = vmatprep.subr.bf16.mxu0 %v1929_v0 }
  0x40   : > { %1767 = vmatprep.subr.bf16.mxu1 %v1930_v1  ;;  %1045 = vmatprep.mubr.bf16.mxu0 %v1933_v4 }
  0x41   : > { %1110 = vmatprep.mubr.bf16.mxu1 %v1935_v5 }
  0x42   : > { %1728 = vmatpush3.bf16.msra.mxu0 %v1931_v2 }
  0x43   : > { %1768 = vmatpush3.bf16.msra.mxu1 %v1932_v3  ;;  %1729 = vmatprep.subr.bf16.mxu0 %v1939_v8 }
  0x44   : > { %1769 = vmatprep.subr.bf16.mxu1 %v1940_v9 }
  0x45   : > { %1046 = vmatmul.mubr.bf16.gmra.mxu0 %v1937_v6 }
  0x46   : > { %1111 = vmatmul.mubr.bf16.gmra.mxu1 %v1938_v7  ;;  %1730 = vmatpush3.bf16.msra.mxu0 %v1941_v10 }
  0x47   : > { %1770 = vmatpush3.bf16.msra.mxu1 %v1942_v11  ;;  %1731 = vmatprep.subr.bf16.mxu0 %v1943_v12 }
  0x48   : > { %1771 = vmatprep.subr.bf16.mxu1 %v1944_v13  ;;  %1151 = vmatprep.mubr.bf16.mxu0 %v1949_v17 }
  0x49   : > { %1216 = vmatprep.mubr.bf16.mxu1 %v1952_v19 }
  0x4a   : > { %1732 = vmatpush3.bf16.msra.mxu0 %v1945_v14 }
  0x4b   : > { %1772 = vmatpush3.bf16.msra.mxu1 %v1946_v15  ;;  %1809 = vmatprep.subr.bf16.mxu0 %v1953_v20 }
  0x4c   : > { %1833 = vmatprep.subr.bf16.mxu1 %v1953_v20 }
  0x4d   : > { %1152 = vmatmul.mubr.bf16.vlgmr.msra.gmra.mxu0 %v1947_v16 }
  0x4e   : > { %1217 = vmatmul.mubr.bf16.vlgmr.msra.gmra.mxu1 %v1950_v18  ;;  %1810 = vmatpush3.bf16.msra.mxu0 %v1953_v20 }
  0x4f   : > { %1841 = vmatpush3.bf16.msra.mxu1 %v1953_v20  ;;  %1811 = vmatprep.subr.bf16.mxu0 %v1954_v21 }
  0x50   : > { %1834 = vmatprep.subr.bf16.mxu1 %v1954_v21  ;;  %1159 = vmatprep.mubr.bf16.mxu0 %v1955_v22 }
  0x51   : > { %1224 = vmatprep.mubr.bf16.mxu1 %v1957_v23 }
  0x52   : > { %1812 = vmatpush3.bf16.msra.mxu0 %v1954_v21 }
  0x53   : > { %1842 = vmatpush3.bf16.msra.mxu1 %v1954_v21  ;;  %1813 = vmatprep.subr.bf16.mxu0 %v1961_v26 }
  0x54   : > { %1835 = vmatprep.subr.bf16.mxu1 %v1961_v26 }
  0x55   : > { %1160 = vmatmul.mubr.bf16.gmra.mxu0 %v1959_v24 }
  0x56   : > { %1225 = vmatmul.mubr.bf16.gmra.mxu1 %v1960_v25  ;;  %1167 = vmatprep.mubr.bf16.mxu0 %v1963_v27 }
  0x57   : > { %1814 = vmatpush3.bf16.msra.mxu0 %v1961_v26  ;;  %1232 = vmatprep.mubr.bf16.mxu1 %v1965_v28 }
  0x58   : > { %1843 = vmatpush3.bf16.msra.mxu1 %v1961_v26  ;;  %1815 = vmatprep.subr.bf16.mxu0 %v1962_v29 }
  0x59   : > { %1836 = vmatprep.subr.bf16.mxu1 %v1962_v29 }
  0x5b   : > { %1816 = vmatpush3.bf16.msra.mxu0 %v1962_v29 }
  0x5c   : > { %1844 = vmatpush3.bf16.msra.mxu1 %v1962_v29  ;;  %1817 = vmatprep.subr.bf16.mxu0 %v1969_v32 }
  0x5d   : > { %1168 = vmatmul.mubr.bf16.gmra.mxu0 %v1967_v30  ;;  %1837 = vmatprep.subr.bf16.mxu1 %v1969_v32 }
  0x5e   : > { %1233 = vmatmul.mubr.bf16.gmra.mxu1 %v1968_v31  ;;  %1175 = vmatprep.mubr.bf16.mxu0 %v1971_v33 }
  0x5f   : > { %1818 = vmatpush3.bf16.msra.mxu0 %v1969_v32  ;;  %1240 = vmatprep.mubr.bf16.mxu1 %v1973_v34 }
  0x60   : > { %1845 = vmatpush3.bf16.msra.mxu1 %v1969_v32  ;;  %1819 = vmatprep.subr.bf16.mxu0 %v1970_v35 }
  0x61   : > { %1838 = vmatprep.subr.bf16.mxu1 %v1970_v35 }
  0x63   : > { %1820 = vmatpush3.bf16.msra.mxu0 %v1970_v35 }
  0x64   : > { %1846 = vmatpush3.bf16.msra.mxu1 %v1970_v35  ;;  %1821 = vmatprep.subr.bf16.mxu0 %v1977_v37 }
  0x65   : > { %1176 = vmatmul.mubr.bf16.gmra.mxu0 %v1975_v36  ;;  %1839 = vmatprep.subr.bf16.mxu1 %v1977_v37 }
  0x66   : > { %1241 = vmatmul.mubr.bf16.gmra.mxu1 %v1976_v38  ;;  %1825 = vmatprep.mubr.bf16.mxu0 %v1979_v39 }
  0x67   : > { %1822 = vmatpush3.bf16.msra.mxu0 %v1977_v37  ;;  %1829 = vmatprep.mubr.bf16.mxu1 %v1980_v40 }
  0x68   : > { %1847 = vmatpush3.bf16.msra.mxu1 %v1977_v37  ;;  %1823 = vmatprep.subr.bf16.mxu0 %v1978_v41 }
  0x69   : > { %1840 = vmatprep.subr.bf16.mxu1 %v1978_v41 }
  0x6b   : > { %1824 = vmatpush3.bf16.msra.mxu0 %v1978_v41 }
  0x6c   : > { %1848 = vmatpush3.bf16.msra.mxu1 %v1978_v41 }
  0x6e   : > { %1826 = vmatmul.mubr.bf16.vlgmr.msra.gmra.mxu0 %v1981_v42 }
  0x6f   : > { %1830 = vmatmul.mubr.bf16.vlgmr.msra.gmra.mxu1 %v1982_v43 }
  0xed   : > { %v1653_v45 = vpop.f32.mrf.mxu0 }
  0xee   : > { %v1693_v46 = vpop.f32.mrf.mxu1 }
  0xef   : > { %v1654_v47 = vpop.f32.mrf.mxu0 }
  0xf0   : > { %v1694_v48 = vpop.f32.mrf.mxu1  ;;  %v1655_v36 = vadd.f32 %v1654_v47, %v1653_v45 }
  0xf1   : > { %v1656_v49 = vpop.f32.mrf.mxu0  ;;  %v1695_v37 = vadd.f32 %v1694_v48, %v1693_v46 }
  0xf2   : > { %v1696_v50 = vpop.f32.mrf.mxu1 }
  0xf3   : > { %v1657_v51 = vpop.f32.mrf.mxu0 }
  0xf4   : > { %v1697_v52 = vpop.f32.mrf.mxu1  ;;  %v1658_v38 = vadd.f32 %v1657_v51, %v1656_v49 }
  0xf5   : > { %v1659_v53 = vpop.f32.mrf.mxu0  ;;  %v1698_v39 = vadd.f32 %v1697_v52, %v1696_v50  ;;  %v1089_v50 = vadd.f32 %v1695_v37, %v1655_v36 }
  0xf6   : > { %v1699_v54 = vpop.f32.mrf.mxu1 }
  0xf7   : > { %v1660_v55 = vpop.f32.mrf.mxu0 }
  0xf8   : > { %v1700_v56 = vpop.f32.mrf.mxu1  ;;  %v1661_v40 = vadd.f32 %v1660_v55, %v1659_v53  ;;  %v1092_v53 = vadd.f32 %v1698_v39, %v1658_v38 }
  0xf9   : > { %v1662_v57 = vpop.f32.mrf.mxu0  ;;  %v1701_v41 = vadd.f32 %v1700_v56, %v1699_v54 }
  0xfa   : > { %v1702_v58 = vpop.f32.mrf.mxu1 }
  0xfb   : > { %v1663_v59 = vpop.f32.mrf.mxu0  ;;  %v1097_v55 = vadd.f32 %v1701_v41, %v1661_v40 }
  0xfc   : > { %v1703_v60 = vpop.f32.mrf.mxu1  ;;  %v1664_v42 = vadd.f32 %v1663_v59, %v1662_v57 }
  0xfd   : > { %v1665_v61 = vpop.f32.mrf.mxu0  ;;  %v1704_v43 = vadd.f32 %v1703_v60, %v1702_v58 }
  0xfe   : > { %v1705_v62 = vpop.f32.mrf.mxu1 }
  0xff   : > { %v1666_v63 = vpop.f32.mrf.mxu0  ;;  %v1100_v54 = vadd.f32 %v1704_v43, %v1664_v42 }
 0x100   : > { %v1706_v0 = vpop.f32.mrf.mxu1 }
 0x101   : > { %v2291_v1 = vpop.f32.mrf.mxu0 }
 0x102   : > { %2316 = vst [vmem:[#allocation2_spill] sm:$0xff] %v2291_v1  ;;  %v2293_v2 = vpop.f32.mrf.mxu1 }
 0x103   : > { %2317 = vst [vmem:[#allocation3_spill] sm:$0xff] %v2293_v2  ;;  %v1669_v3 = vpop.f32.mrf.mxu0  ;;  %v1707_v2 = vadd.f32 %v1706_v0, %v1705_v62 }
 0x104   : > { %v1709_v4 = vpop.f32.mrf.mxu1 }
 0x105   : > { %v1671_v5 = vpop.f32.mrf.mxu0 }
 0x106   : > { %v1711_v6 = vpop.f32.mrf.mxu1 }
 0x107   : > { %v1672_v7 = vpop.f32.mrf.mxu0 }
 0x108   : > { %v1712_v8 = vpop.f32.mrf.mxu1  ;;  %v1673_v1 = vadd.f32 %v1672_v7, %v1671_v5 }
 0x109   : > { %v1674_v9 = vpop.f32.mrf.mxu0  ;;  %v1713_v45 = vadd.f32 %v1712_v8, %v1711_v6  ;;  %v2320_v60 = vld [vmem:[#allocation2_spill] sm:$0xff] }
 0x10a   : > { %v1714_v10 = vpop.f32.mrf.mxu1 }
 0x10b   : > { %v1675_v11 = vpop.f32.mrf.mxu0  ;;  %v1113_v5 = vadd.f32 %v1713_v45, %v1673_v1 }
 0x10c   : > { %v1715_v12 = vpop.f32.mrf.mxu1  ;;  %v1676_v47 = vadd.f32 %v1675_v11, %v1674_v9 }
 0x10d   : > { %v1733_v13 = vpop.f32.mrf.mxu0  ;;  %v1716_v46 = vadd.f32 %v1715_v12, %v1714_v10 }
 0x10e   : > { %v1773_v14 = vpop.f32.mrf.mxu1 }
 0x10f   : > { %v1734_v15 = vpop.f32.mrf.mxu0  ;;  %v1116_v6 = vadd.f32 %v1716_v46, %v1676_v47 }
 0x110   : > { %v1774_v16 = vpop.f32.mrf.mxu1  ;;  %v1735_v48 = vadd.f32 %v1734_v15, %v1733_v13 }
 0x111   : > { %v1736_v17 = vpop.f32.mrf.mxu0  ;;  %v1775_v8 = vadd.f32 %v1774_v16, %v1773_v14 }
 0x112   : > { %v2295_v18 = vpop.f32.mrf.mxu1  ;;  %v1154_v7 = vadd.f32 %v1735_v48, %v1089_v50 }
 0x113   : > { %2318 = vst [vmem:[#allocation4_spill] sm:$0xff] %v2295_v18  ;;  %v1737_v19 = vpop.f32.mrf.mxu0  ;;  %v1667_v18 = vadd.f32 %v1666_v63, %v1665_v61  ;;  %v1670_v61 = vadd.f32 %v1669_v3, %v2320_v60  ;;  %v2321_v63 = vld [vmem:[#allocation3_spill] sm:$0xff] }
 0x114   : > { %v2297_v20 = vpop.f32.mrf.mxu1  ;;  %v1710_v62 = vadd.f32 %v1709_v4, %v2321_v63  ;;  %v1738_v11 = vadd.f32 %v1737_v19, %v1736_v17  ;;  %v1219_v40 = vadd.f32 %v1775_v8, %v1154_v7 }
 0x115   : > { %2319 = vst [vmem:[#allocation5_spill] sm:$0xff] %v2297_v20  ;;  %v1739_v21 = vpop.f32.mrf.mxu0  ;;  %v1105_v58 = vadd.f32 %v1707_v2, %v1667_v18 }
 0x116   : > { %v1779_v22 = vpop.f32.mrf.mxu1  ;;  %v1108_v1 = vadd.f32 %v1710_v62, %v1670_v61 }
 0x117   : > { %v1740_v23 = vpop.f32.mrf.mxu0 }
 0x118   : > { %v1780_v24 = vpop.f32.mrf.mxu1  ;;  %v1741_v52 = vadd.f32 %v1740_v23, %v1739_v21 }
 0x119   : > { %v1742_v25 = vpop.f32.mrf.mxu0  ;;  %v1781_v21 = vadd.f32 %v1780_v24, %v1779_v22 }
 0x11a   : > { %v1782_v26 = vpop.f32.mrf.mxu1  ;;  %v1162_v12 = vadd.f32 %v1741_v52, %v1097_v55  ;;  %v2322_v14 = vld [vmem:[#allocation4_spill] sm:$0xff] }
 0x11b   : > { %v1743_v27 = vpop.f32.mrf.mxu0 }
 0x11c   : > { %v1783_v28 = vpop.f32.mrf.mxu1  ;;  %v1744_v0 = vadd.f32 %v1743_v27, %v1742_v25  ;;  %v1157_v27 = vadd.f32 %v1738_v11, %v1092_v53  ;;  %v2323_v16 = vld [vmem:[#allocation5_spill] sm:$0xff]  ;;  %v1227_v39 = vadd.f32 %v1781_v21, %v1162_v12 }
 0x11d   : > { %v1745_v29 = vpop.f32.mrf.mxu0  ;;  %v1784_v3 = vadd.f32 %v1783_v28, %v1782_v26  ;;  %v1778_v38 = vadd.f32 %v2323_v16, %v2322_v14 }
 0x11e   : > { %v1785_v30 = vpop.f32.mrf.mxu1  ;;  %v1165_v18 = vadd.f32 %v1744_v0, %v1100_v54 }
 0x11f   : > { %v1746_v31 = vpop.f32.mrf.mxu0  ;;  %v1222_v46 = vadd.f32 %v1778_v38, %v1157_v27 }
 0x120   : > { %v1786_v32 = vpop.f32.mrf.mxu1  ;;  %v1747_v13 = vadd.f32 %v1746_v31, %v1745_v29  ;;  %v1230_v28 = vadd.f32 %v1784_v3, %v1165_v18 }
 0x121   : > { %v1748_v33 = vpop.f32.mrf.mxu0  ;;  %v1787_v19 = vadd.f32 %v1786_v32, %v1785_v30 }
 0x122   : > { %v1788_v34 = vpop.f32.mrf.mxu1  ;;  %v1170_v17 = vadd.f32 %v1747_v13, %v1105_v58 }
 0x123   : > { %v1749_v35 = vpop.f32.mrf.mxu0 }
 0x124   : > { %v1789_v44 = vpop.f32.mrf.mxu1 }
 0x125   : > { %v1751_v20 = vpop.f32.mrf.mxu0  ;;  %v1790_v22 = vadd.f32 %v1789_v44, %v1788_v34 }
 0x126   : > { %v1791_v49 = vpop.f32.mrf.mxu1 }
 0x127   : > { %v1752_v51 = vpop.f32.mrf.mxu0 }
 0x128   : > { %v1753_v56 = vadd.f32 %v1752_v51, %v1751_v20  ;;  %v1792_v57 = vpop.f32.mrf.mxu1  ;;  %v1750_v20 = vadd.f32 %v1749_v35, %v1748_v33 }
 0x129   : > { %v1754_v59 = vpop.f32.mrf.mxu0  ;;  %v1793_v36 = vadd.f32 %v1792_v57, %v1791_v49  ;;  %v1235_v49 = vadd.f32 %v1787_v19, %v1170_v17 }
 0x12a   : > { %v1794_v9 = vpop.f32.mrf.mxu1  ;;  %v1178_v23 = vadd.f32 %v1753_v56, %v1113_v5  ;;  %v1173_v31 = vadd.f32 %v1750_v20, %v1108_v1 }
 0x12b   : > { %v1755_v10 = vpop.f32.mrf.mxu0 }
 0x12c   : > { %v1756_v15 = vadd.f32 %v1755_v10, %v1754_v59  ;;  %v1795_v2 = vpop.f32.mrf.mxu1  ;;  %v1243_v24 = vadd.f32 %v1793_v36, %v1178_v23  ;;  %v1238_v34 = vadd.f32 %v1790_v22, %v1173_v31 }
 0x12d   : > { %v1796_v4 = vadd.f32 %v1795_v2, %v1794_v9 }
 0x12e   : > { %v1181_v37 = vadd.f32 %v1756_v15, %v1116_v6  ;;  %v1827_v25 = vpop.f32.mrf.mxu0 }
 0x12f   : > { %v1831_v29 = vpop.f32.mrf.mxu1  ;;  %v1292_v42 = vadd.f32 %v1827_v25, %v1227_v39 }
 0x130   : > { %v1283_v33 = vpop.f32.mrf.mxu0  ;;  %v1246_v35 = vadd.f32 %v1796_v4, %v1181_v37  ;;  %v1308_v48 = vadd.f32 %v1831_v29, %v1243_v24 }
 0x131   : > { %v1299_v26 = vpop.f32.mrf.mxu1  ;;  %v1284_v43 = vadd.f32 %v1283_v33, %v1219_v40  ;;  %v1371_v60 = vmul.f32 %v1292_v42, %v1292_v42 }
 0x132   : > { %v1828_v41 = vpop.f32.mrf.mxu0  ;;  %v1300_v52 = vadd.f32 %v1299_v26, %v1235_v49  ;;  %v1375_v12 = vmul.f32 %v1308_v48, %v1308_v48 }
 0x133   : > { %v1295_v45 = vadd.f32 %v1828_v41, %v1230_v28  ;;  %v1832_v47 = vpop.f32.mrf.mxu1  ;;  %v1369_v54 = vmul.f32 %v1284_v43, %v1284_v43 }
 0x134   : > { %v1311_v30 = vadd.f32 %v1832_v47, %v1246_v35  ;;  %v1286_v32 = vpop.f32.mrf.mxu0  ;;  %v1373_v6 = vmul.f32 %v1300_v52, %v1300_v52 }
 0x135   : > { %v1622_v44 = vpack.c.bf16 %v1295_v45, %v1292_v42  ;;  %v1287_v51 = vadd.f32 %v1286_v32, %v1222_v46  ;;  %v1302_v50 = vpop.f32.mrf.mxu1  ;;  %v1372_v62 = vmul.f32 %v1295_v45, %v1295_v45 }
 0x136   : > { %v1632_v53 = vpack.c.bf16 %v1311_v30, %v1308_v48  ;;  %v1303_v55 = vadd.f32 %v1302_v50, %v1238_v34  ;;  %v1376_v21 = vmul.f32 %v1311_v30, %v1311_v30 }
 0x137   : > { %1634 = vst [vmem:[%s182_s26 + $0x8] sm:$0xff] %v1622_v44   ;;  %v1617_v56 = vpack.c.bf16 %v1287_v51, %v1284_v43  ;;  %v1355_v57 = vadd.f32 %v1287_v51, %v1284_v43  ;;  %v1370_v59 = vmul.f32 %v1287_v51, %v1287_v51 }
 0x138   : > { %1636 = vst [vmem:[%s182_s26 + $0x18] sm:$0xff] %v1632_v53   ;;  %v1627_v58 = vpack.c.bf16 %v1303_v55, %v1300_v52  ;;  %v1374_v10 = vmul.f32 %v1303_v55, %v1303_v55 }
 0x139   : > { %1618 = vst [vmem:[%s182_s26] sm:$0xff] %v1617_v56   ;;  %v1356_v61 = vadd.f32 %v1355_v57, %v1292_v42  ;;  %v1377_v63 = vadd.f32 %v1370_v59, %v1369_v54 }
 0x13a   : > { %1635 = vst [vmem:[%s182_s26 + $0x10] sm:$0xff] %v1627_v58  }
 0x13b   : > { %v1378_v0 = vadd.f32 %v1377_v63, %v1371_v60  ;;  %v1357_v5 = vadd.f32 %v1356_v61, %v1295_v45 }
 0x13d   : > { %v1358_v7 = vadd.f32 %v1357_v5, %v1300_v52  ;;  %v1379_v8 = vadd.f32 %v1378_v0, %v1372_v62 }
 0x13f   : > { %v1359_v9 = vadd.f32 %v1358_v7, %v1303_v55  ;;  %v1380_v11 = vadd.f32 %v1379_v8, %v1373_v6 }
 0x141   : > { %v1360_v13 = vadd.f32 %v1359_v9, %v1308_v48  ;;  %v1381_v15 = vadd.f32 %v1380_v11, %v1374_v10 }
 0x143   : > { %v1361_v20 = vadd.f32 %v1360_v13, %v1311_v30  ;;  %v1382_v23 = vadd.f32 %v1381_v15, %v1375_v12 }
 0x145   : > { %v1362_v36 = vrot.slane %v1361_v20, 4  ;;  %v1383_v2 = vadd.f32 %v1382_v23, %v1376_v21 }
 0x147   : > { %v1363_v18 = vadd.f32 %v1362_v36, %v1361_v20  ;;  %v1384_v3 = vrot.slane %v1383_v2, 4 }
 0x149   : > { %v1364_v37 = vrot.slane %v1363_v18, 2  ;;  %v1385_v4 = vadd.f32 %v1384_v3, %v1383_v2 }
 0x14b   : > { %v1365_v1 = vadd.f32 %v1364_v37, %v1363_v18  ;;  %v1386_v25 = vrot.slane %v1385_v4, 2 }
 0x14d   : > { %v1366_v27 = vrot.slane %v1365_v1, 1  ;;  %v1387_v14 = vadd.f32 %v1386_v25, %v1385_v4 }
 0x14f   : > { %v1367_v16 = vadd.f32 %v1366_v27, %v1365_v1  ;;  %v1388_v38 = vrot.slane %v1387_v14, 1 }
 0x151   : > { %1368 = vst [vmem:[%s2288_s24] sm:$0x1] %v1367_v16  ;;  %v1389_v17 = vadd.f32 %v1388_v38, %v1387_v14 }
 0x153   : > { %1390 = vst [vmem:[%s2288_s24 + $0x1] sm:$0x1] %v1389_v17 }
 0x154 PF: > { %s14_s12 = sadd.s32 1, %s1989_s12  }
 0x155   : > { %p11_p5 = scmp.ge.s32.totalorder %s14_s12, 4  }
 0x157   :  { %13 = sbr.rel (!%p11_p5) target bundleno = 1 (0x1), region = 70 }

</bundles_post_ra>
